<compile_context>
chip_gen: v5e
topology: v5e:2x2
jax: 0.10.0
libtpu: 0.0.40
codegen_flags: <defaults>
</compile_context>

<pallas_src>
import jax
import jax.numpy as jnp
from jax.experimental import pallas as pl
from jax.experimental.pallas import tpu as pltpu


# ---------------------------------------------------------------------------
# Shared gate math (pure jnp: used both inside the kernel and in the reference)
# ---------------------------------------------------------------------------
def _lstm_gates(z, c, hidden):
    # PyTorch gate order: i, f, g, o
    i = jax.nn.sigmoid(z[:, 0 * hidden:1 * hidden])
    f = jax.nn.sigmoid(z[:, 1 * hidden:2 * hidden])
    g = jnp.tanh(z[:, 2 * hidden:3 * hidden])
    o = jax.nn.sigmoid(z[:, 3 * hidden:4 * hidden])
    c_new = f * c + i * g
    h_new = o * jnp.tanh(c_new)
    return h_new, c_new


# ---------------------------------------------------------------------------
# Fused kernel: grid=(1,) -- entire T-step recurrence inside one invocation
# ---------------------------------------------------------------------------
def make_fused_kernel(T, num_rnn_layers, gnn_hidden, rnn_hidden):
    L = num_rnn_layers
    f32 = jnp.float32
    bf16 = jnp.bfloat16

    def kernel(*refs):
        it = iter(refs)
        # --- inputs (all resident, constant index maps) ---
        a_ref = next(it)            # (T, N, N)   bf16 normalized adjacency
        x_ref = next(it)            # (T, N, F)   bf16 node features
        gnn_wh = next(it)[...]      # (gnn_h, 4*gnn_h)  bf16
        gnn_b = next(it)[...]       # (1, 4*gnn_h)      f32
        wx0 = next(it)[...]         # (F, 4*rnn_h)      bf16
        wh0 = next(it)[...]         # (rnn_h, 4*rnn_h)  bf16
        b0 = next(it)[...]          # (1, 4*rnn_h)      f32
        upper = [(next(it)[...], next(it)[...]) for _ in range(L - 1)]  # (Wcat,b)
        wg = next(it)[...]          # (gnn_h, C) bf16
        wr = next(it)[...]          # (rnn_h, C) bf16
        dec_b = next(it)[...]       # (1, C)     f32
        # --- outputs ---
        out_ref = next(it)          # (N, C)      log_softmax output
        hg_ref = next(it)           # (N, gnn_h)  final GNN h
        cg_ref = next(it)           # (N, gnn_h)  final GNN c
        h0h_ref = next(it)          # (N, rnn_h)  layer-0 h after t=0
        h0c_ref = next(it)          # (N, rnn_h)  layer-0 c after t=0

        N = a_ref.shape[1]

        # Hoist bias broadcasts out of the unrolled time loop.
        gnn_bb = jnp.broadcast_to(gnn_b, (N, gnn_b.shape[-1]))
        b0b = jnp.broadcast_to(b0, (N, b0.shape[-1]))
        upper_bb = [jnp.broadcast_to(b, (N, b.shape[-1])) for _, b in upper]
        dec_bb = jnp.broadcast_to(dec_b, (N, dec_b.shape[-1]))

        # Recurrence state lives in values (f32) — never touches HBM.
        h_g = jnp.zeros((N, gnn_hidden), f32)
        c_g = jnp.zeros((N, gnn_hidden), f32)
        states = [(jnp.zeros((N, rnn_hidden), f32),
                   jnp.zeros((N, rnn_hidden), f32)) for _ in range(L)]
        h0_snapshot = None
        rnn_out = states[-1][0]

        for t in range(T):  # T static & tiny -> fully unrolled at trace time
            # ---- graph-conv LSTM step (GNN branch) ----
            a_t = a_ref[t]                                    # (N, N) bf16
            ah = jnp.dot(a_t, h_g.astype(bf16), preferred_element_type=f32)
            zg = jnp.dot(ah.astype(bf16), gnn_wh,
                         preferred_element_type=f32) + gnn_bb
            h_g, c_g = _lstm_gates(zg, c_g, gnn_hidden)

            # ---- stacked LSTM, layer 0 (x-dot is off the serial chain) ----
            h0, c0 = states[0]
            z0 = (jnp.dot(x_ref[t], wx0, preferred_element_type=f32)
                  + jnp.dot(h0.astype(bf16), wh0, preferred_element_type=f32)
                  + b0b)
            h0, c0 = _lstm_gates(z0, c0, rnn_hidden)
            states[0] = (h0, c0)
            inp = h0

            # ---- upper layers: fused [inp | h] @ [Wx ; Wh] single MXU dot ----
            for l in range(1, L):
                wcat, _ = upper[l - 1]
                h_l, c_l = states[l]
                cat = jnp.concatenate([inp, h_l], axis=1).astype(bf16)
                z = jnp.dot(cat, wcat, preferred_element_type=f32) + upper_bb[l - 1]
                h_l, c_l = _lstm_gates(z, c_l, rnn_hidden)
                states[l] = (h_l, c_l)
                inp = h_l

            rnn_out = inp
            if t == 0:
                # h0_n = [get_hidden(hidden_states_n[0])] -> layer-0 (h, c) at t=0
                h0_snapshot = (states[0][0], states[0][1])

        # ---- decoder: concat([h_g, rnn_out],1)@W + b == h_g@Wg + rnn@Wr + b ----
        logits = (jnp.dot(h_g.astype(bf16), wg, preferred_element_type=f32)
                  + jnp.dot(rnn_out.astype(bf16), wr, preferred_element_type=f32)
                  + dec_bb)
        m = jnp.max(logits, axis=1, keepdims=True)
        s = logits - m
        out_ref[...] = s - jnp.log(jnp.sum(jnp.exp(s), axis=1, keepdims=True))
        hg_ref[...] = h_g
        cg_ref[...] = c_g
        h0h_ref[...] = h0_snapshot[0]
        h0c_ref[...] = h0_snapshot[1]

    return kernel


# ---------------------------------------------------------------------------
# Adjacency construction (vmapped over the window), params, forward wrapper
# ---------------------------------------------------------------------------
def build_norm_adj(edge_index, edge_attr, num_nodes):
    src, dst = edge_index[0], edge_index[1]
    a = jnp.zeros((num_nodes, num_nodes), jnp.float32).at[dst, src].add(edge_attr)
    a = a + jnp.eye(num_nodes, dtype=jnp.float32)            # self loops
    deg = jnp.sum(a, axis=1)
    dinv = jnp.where(deg > 0, 1.0 / jnp.sqrt(deg), 0.0)
    return a * dinv[:, None] * dinv[None, :]                  # D^-1/2 (A+I) D^-1/2


def init_params(key, num_features, rnn_hidden, gnn_hidden, num_classes,
                num_rnn_layers):
    def unif(k, shape, scale):
        return jax.random.uniform(k, shape, jnp.float32, -scale, scale)

    keys = jax.random.split(key, 5 + 3 * num_rnn_layers)
    sg = 1.0 / jnp.sqrt(gnn_hidden)
    sr = 1.0 / jnp.sqrt(rnn_hidden)
    sd = 1.0 / jnp.sqrt(gnn_hidden + rnn_hidden)   # Linear(gnn_h + rnn_h, C) fan-in
    params = {
        "gnn": {"wh": unif(keys[0], (gnn_hidden, 4 * gnn_hidden), sg),
                "b": unif(keys[1], (1, 4 * gnn_hidden), sg)},
        "rnn": [],
        "dec": {"wg": unif(keys[2], (gnn_hidden, num_classes), sd),
                "wr": unif(keys[3], (rnn_hidden, num_classes), sd),
                "b": unif(keys[4], (1, num_classes), sd)},
    }
    # TODO(synk): combined LSTM bias (b_ih + b_hh folded) — math-equivalent, init differs.
    for l in range(num_rnn_layers):
        fin = num_features if l == 0 else rnn_hidden
        k0, k1, k2 = keys[5 + 3 * l: 8 + 3 * l]
        params["rnn"].append({"wx": unif(k0, (fin, 4 * rnn_hidden), sr),
                              "wh": unif(k1, (rnn_hidden, 4 * rnn_hidden), sr),
                              "b": unif(k2, (1, 4 * rnn_hidden), sr)})
    return params


def rgnn_rnn_forward(params, x_seq, edge_index_seq, edge_attr_seq):
    T, N, _F = x_seq.shape
    gnn_hidden = params["gnn"]["wh"].shape[0]
    rnn_hidden = params["rnn"][0]["wh"].shape[0]
    num_classes = params["dec"]["wg"].shape[1]
    L = len(params["rnn"])
    bf16 = jnp.bfloat16

    # Batched adjacency build (one scatter for all timesteps), bf16 MXU operand.
    a_hat_seq = jax.vmap(build_norm_adj, in_axes=(0, 0, None))(
        edge_index_seq, edge_attr_seq, N).astype(bf16)

    p0 = params["rnn"][0]
    inputs = [a_hat_seq, x_seq.astype(bf16),
              params["gnn"]["wh"].astype(bf16), params["gnn"]["b"],
              p0["wx"].astype(bf16), p0["wh"].astype(bf16), p0["b"]]
    for l in range(1, L):
        pr = params["rnn"][l]
        # Fused recurrent weight: [Wx ; Wh] -> one MXU dot per step per layer.
        inputs += [jnp.concatenate([pr["wx"], pr["wh"]], axis=0).astype(bf16),
                   pr["b"]]
    inputs += [params["dec"]["wg"].astype(bf16),
               params["dec"]["wr"].astype(bf16),
               params["dec"]["b"]]

    def const_spec(arr):
        nd = arr.ndim
        return pl.BlockSpec(arr.shape, lambda i, nd=nd: (0,) * nd)

    in_specs = [const_spec(a) for a in inputs]

    out_shapes = (jax.ShapeDtypeStruct((N, num_classes), jnp.float32),
                  jax.ShapeDtypeStruct((N, gnn_hidden), jnp.float32),
                  jax.ShapeDtypeStruct((N, gnn_hidden), jnp.float32),
                  jax.ShapeDtypeStruct((N, rnn_hidden), jnp.float32),
                  jax.ShapeDtypeStruct((N, rnn_hidden), jnp.float32))
    out_specs = tuple(pl.BlockSpec(s.shape, lambda i: (0, 0)) for s in out_shapes)

    kernel = make_fused_kernel(T, L, gnn_hidden, rnn_hidden)

    out, hg, cg, h0h, h0c = pl.pallas_call(
        kernel,
        out_shape=out_shapes,
        grid_spec=pltpu.PrefetchScalarGridSpec(
            num_scalar_prefetch=0,
            grid=(1,),                       # single invocation, no per-step DMAs
            in_specs=in_specs,
            out_specs=out_specs),
        compiler_params=pltpu.CompilerParams(
            dimension_semantics=("arbitrary",)),
    )(*inputs)

    h0_n = [(h0h, h0c)]
    return out, h0_n, (hg, cg)


rgnn_rnn_forward_jit = jax.jit(rgnn_rnn_forward)


# ---------------------------------------------------------------------------
# Pure-JAX reference (un-fused) with the SAME precision policy
# (bf16 MXU operands, f32 accumulation & gate math) for a tight check.
# ---------------------------------------------------------------------------
def reference_forward(params, x_seq, edge_index_seq, edge_attr_seq):
    bf16 = jnp.bfloat16
    f32 = jnp.float32
    T, N, _ = x_seq.shape
    gnn_hidden = params["gnn"]["wh"].shape[0]
    rnn_hidden = params["rnn"][0]["wh"].shape[0]
    L = len(params["rnn"])

    gw = params["gnn"]["wh"].astype(bf16)
    gb = params["gnn"]["b"]
    p0 = params["rnn"][0]
    wx0, wh0, b0 = p0["wx"].astype(bf16), p0["wh"].astype(bf16), p0["b"]
    wcats = [jnp.concatenate([params["rnn"][l]["wx"], params["rnn"][l]["wh"]],
                             axis=0).astype(bf16) for l in range(1, L)]
    bs = [params["rnn"][l]["b"] for l in range(1, L)]
    wg = params["dec"]["wg"].astype(bf16)
    wr = params["dec"]["wr"].astype(bf16)
    db = params["dec"]["b"]

    h_g = jnp.zeros((N, gnn_hidden), f32)
    c_g = jnp.zeros((N, gnn_hidden), f32)
    states = [(jnp.zeros((N, rnn_hidden), f32),
               jnp.zeros((N, rnn_hidden), f32)) for _ in range(L)]
    h0_n = None
    inp = states[-1][0]
    for t in range(T):
        a = build_norm_adj(edge_index_seq[t], edge_attr_seq[t], N).astype(bf16)
        ah = jnp.dot(a, h_g.astype(bf16), preferred_element_type=f32)
        zg = jnp.dot(ah.astype(bf16), gw, preferred_element_type=f32) + gb
        h_g, c_g = _lstm_gates(zg, c_g, gnn_hidden)

        h0, c0 = states[0]
        z0 = (jnp.dot(x_seq[t].astype(bf16), wx0, preferred_element_type=f32)
              + jnp.dot(h0.astype(bf16), wh0, preferred_element_type=f32) + b0)
        h0, c0 = _lstm_gates(z0, c0, rnn_hidden)
        states[0] = (h0, c0)
        inp = h0
        for l in range(1, L):
            h, c = states[l]
            cat = jnp.concatenate([inp, h], axis=1).astype(bf16)
            z = jnp.dot(cat, wcats[l - 1], preferred_element_type=f32) + bs[l - 1]
            h, c = _lstm_gates(z, c, rnn_hidden)
            states[l] = (h, c)
            inp = h
        if t == 0:
            h0_n = (states[0][0], states[0][1])

    logits = (jnp.dot(h_g.astype(bf16), wg, preferred_element_type=f32)
              + jnp.dot(inp.astype(bf16), wr, preferred_element_type=f32) + db)
    return jax.nn.log_softmax(logits, axis=1), h0_n, (h_g, c_g)


if __name__ == "__main__":
    # window=4, nodes=16, features=8, gnn_hidden=32, rnn_hidden=32,
    # num_classes=4, num_rnn_layers=2, edges=48
    T, N, F = 4, 16, 8
    GNN_H, RNN_H, NUM_CLASSES, NUM_RNN_LAYERS, E = 32, 32, 4, 2, 48

    key = jax.random.PRNGKey(0)
    kx, ke, ka, kp = jax.random.split(key, 4)

    x_seq = jax.random.normal(kx, (T, N, F), jnp.float32)
    edge_index_seq = jax.random.randint(ke, (T, 2, E), 0, N, jnp.int32)
    edge_attr_seq = jnp.abs(jax.random.normal(ka, (T, E), jnp.float32)) + 0.1

    params = init_params(kp, F, RNN_H, GNN_H, NUM_CLASSES, NUM_RNN_LAYERS)

    output, h0_n, hidden_g = rgnn_rnn_forward_jit(
        params, x_seq, edge_index_seq, edge_attr_seq)
    jax.block_until_ready(output)
    jax.block_until_ready(h0_n[0][0])
    jax.block_until_ready(hidden_g[0])

    assert output.shape == (N, NUM_CLASSES)
    # rows of log_softmax must sum (in prob space) to 1
    assert jnp.allclose(jnp.sum(jnp.exp(output), axis=1), 1.0, atol=1e-4)

    # correctness vs. un-fused pure-JAX reference using the same precision policy
    ref_out, ref_h0, (ref_hg, ref_cg) = reference_forward(
        params, x_seq, edge_index_seq, edge_attr_seq)
    assert jnp.allclose(output, ref_out, atol=2e-2, rtol=2e-2)
    assert jnp.allclose(h0_n[0][0], ref_h0[0], atol=2e-2, rtol=2e-2)
    assert jnp.allclose(h0_n[0][1], ref_h0[1], atol=2e-2, rtol=2e-2)
    assert jnp.allclose(hidden_g[0], ref_hg, atol=2e-2, rtol=2e-2)
    assert jnp.allclose(hidden_g[1], ref_cg, atol=2e-2, rtol=2e-2)

    print("KERNEL_OK")
</pallas_src>

<mosaic_0001>
module attributes {stable_mosaic.version = 11 : i64} {
  func.func @kernel(%arg0: i32, %arg1: memref<4x16x16xbf16, #tpu.memory_space<vmem>>, %arg2: memref<4x16x8xbf16, #tpu.memory_space<vmem>>, %arg3: memref<32x128xbf16, #tpu.memory_space<vmem>>, %arg4: memref<1x128xf32, #tpu.memory_space<vmem>>, %arg5: memref<8x128xbf16, #tpu.memory_space<vmem>>, %arg6: memref<32x128xbf16, #tpu.memory_space<vmem>>, %arg7: memref<1x128xf32, #tpu.memory_space<vmem>>, %arg8: memref<64x128xbf16, #tpu.memory_space<vmem>>, %arg9: memref<1x128xf32, #tpu.memory_space<vmem>>, %arg10: memref<32x4xbf16, #tpu.memory_space<vmem>>, %arg11: memref<32x4xbf16, #tpu.memory_space<vmem>>, %arg12: memref<1x4xf32, #tpu.memory_space<vmem>>, %arg13: memref<16x4xf32, #tpu.memory_space<vmem>>, %arg14: memref<16x32xf32, #tpu.memory_space<vmem>>, %arg15: memref<16x32xf32, #tpu.memory_space<vmem>>, %arg16: memref<16x32xf32, #tpu.memory_space<vmem>>, %arg17: memref<16x32xf32, #tpu.memory_space<vmem>>) attributes {dimension_semantics = [#tpu.dimension_semantics<arbitrary>], iteration_bounds = array<i64: 1>, scalar_prefetch = 0 : i64, scratch_operands = 0 : i64, tpu.core_type = #tpu.core_type<tc>, window_params = [{pipeline_mode = #tpu.pipeline_mode<synchronous>, transform_indices = @transform_0, window_bounds = array<i64: 4, 16, 16>}, {pipeline_mode = #tpu.pipeline_mode<synchronous>, transform_indices = @transform_1, window_bounds = array<i64: 4, 16, 8>}, {pipeline_mode = #tpu.pipeline_mode<synchronous>, transform_indices = @transform_2, window_bounds = array<i64: 32, 128>}, {pipeline_mode = #tpu.pipeline_mode<synchronous>, transform_indices = @transform_3, window_bounds = array<i64: 1, 128>}, {pipeline_mode = #tpu.pipeline_mode<synchronous>, transform_indices = @transform_4, window_bounds = array<i64: 8, 128>}, {pipeline_mode = #tpu.pipeline_mode<synchronous>, transform_indices = @transform_5, window_bounds = array<i64: 32, 128>}, {pipeline_mode = #tpu.pipeline_mode<synchronous>, transform_indices = @transform_6, window_bounds = array<i64: 1, 128>}, {pipeline_mode = #tpu.pipeline_mode<synchronous>, transform_indices = @transform_7, window_bounds = array<i64: 64, 128>}, {pipeline_mode = #tpu.pipeline_mode<synchronous>, transform_indices = @transform_8, window_bounds = array<i64: 1, 128>}, {pipeline_mode = #tpu.pipeline_mode<synchronous>, transform_indices = @transform_9, window_bounds = array<i64: 32, 4>}, {pipeline_mode = #tpu.pipeline_mode<synchronous>, transform_indices = @transform_10, window_bounds = array<i64: 32, 4>}, {pipeline_mode = #tpu.pipeline_mode<synchronous>, transform_indices = @transform_11, window_bounds = array<i64: 1, 4>}, {pipeline_mode = #tpu.pipeline_mode<synchronous>, transform_indices = @transform_12, window_bounds = array<i64: 16, 4>}, {pipeline_mode = #tpu.pipeline_mode<synchronous>, transform_indices = @transform_13, window_bounds = array<i64: 16, 32>}, {pipeline_mode = #tpu.pipeline_mode<synchronous>, transform_indices = @transform_14, window_bounds = array<i64: 16, 32>}, {pipeline_mode = #tpu.pipeline_mode<synchronous>, transform_indices = @transform_15, window_bounds = array<i64: 16, 32>}, {pipeline_mode = #tpu.pipeline_mode<synchronous>, transform_indices = @transform_16, window_bounds = array<i64: 16, 32>}]} {
    %c0 = arith.constant 0 : index
    %c0_0 = arith.constant 0 : index
    %0 = vector.load %arg3[%c0, %c0_0] : memref<32x128xbf16, #tpu.memory_space<vmem>>, vector<32x128xbf16>
    %c0_1 = arith.constant 0 : index
    %c0_2 = arith.constant 0 : index
    %1 = vector.load %arg4[%c0_1, %c0_2] : memref<1x128xf32, #tpu.memory_space<vmem>>, vector<1x128xf32>
    %c0_3 = arith.constant 0 : index
    %c0_4 = arith.constant 0 : index
    %2 = vector.load %arg5[%c0_3, %c0_4] : memref<8x128xbf16, #tpu.memory_space<vmem>>, vector<8x128xbf16>
    %c0_5 = arith.constant 0 : index
    %c0_6 = arith.constant 0 : index
    %3 = vector.load %arg6[%c0_5, %c0_6] : memref<32x128xbf16, #tpu.memory_space<vmem>>, vector<32x128xbf16>
    %c0_7 = arith.constant 0 : index
    %c0_8 = arith.constant 0 : index
    %4 = vector.load %arg7[%c0_7, %c0_8] : memref<1x128xf32, #tpu.memory_space<vmem>>, vector<1x128xf32>
    %c0_9 = arith.constant 0 : index
    %c0_10 = arith.constant 0 : index
    %5 = vector.load %arg8[%c0_9, %c0_10] : memref<64x128xbf16, #tpu.memory_space<vmem>>, vector<64x128xbf16>
    %c0_11 = arith.constant 0 : index
    %c0_12 = arith.constant 0 : index
    %6 = vector.load %arg9[%c0_11, %c0_12] : memref<1x128xf32, #tpu.memory_space<vmem>>, vector<1x128xf32>
    %c0_13 = arith.constant 0 : index
    %c0_14 = arith.constant 0 : index
    %7 = vector.load %arg10[%c0_13, %c0_14] : memref<32x4xbf16, #tpu.memory_space<vmem>>, vector<32x4xbf16>
    %c0_15 = arith.constant 0 : index
    %c0_16 = arith.constant 0 : index
    %8 = vector.load %arg11[%c0_15, %c0_16] : memref<32x4xbf16, #tpu.memory_space<vmem>>, vector<32x4xbf16>
    %c0_17 = arith.constant 0 : index
    %c0_18 = arith.constant 0 : index
    %9 = vector.load %arg12[%c0_17, %c0_18] : memref<1x4xf32, #tpu.memory_space<vmem>>, vector<1x4xf32>
    %10 = vector.shape_cast %1 : vector<1x128xf32> to vector<1x128xf32>
    %11 = vector.broadcast %10 : vector<1x128xf32> to vector<16x128xf32>
    %12 = vector.shape_cast %4 : vector<1x128xf32> to vector<1x128xf32>
    %13 = vector.broadcast %12 : vector<1x128xf32> to vector<16x128xf32>
    %14 = vector.shape_cast %6 : vector<1x128xf32> to vector<1x128xf32>
    %15 = vector.broadcast %14 : vector<1x128xf32> to vector<16x128xf32>
    %16 = vector.shape_cast %9 : vector<1x4xf32> to vector<1x4xf32>
    %17 = vector.broadcast %16 : vector<1x4xf32> to vector<16x4xf32>
    %cst = arith.constant 0.000000e+00 : f32
    %18 = vector.broadcast %cst : f32 to vector<16x32xf32>
    %cst_19 = arith.constant 0.000000e+00 : f32
    %19 = vector.broadcast %cst_19 : f32 to vector<16x32xf32>
    %cst_20 = arith.constant 0.000000e+00 : f32
    %20 = vector.broadcast %cst_20 : f32 to vector<16x32xf32>
    %cst_21 = arith.constant 0.000000e+00 : f32
    %21 = vector.broadcast %cst_21 : f32 to vector<16x32xf32>
    %cst_22 = arith.constant 0.000000e+00 : f32
    %22 = vector.broadcast %cst_22 : f32 to vector<16x32xf32>
    %cst_23 = arith.constant 0.000000e+00 : f32
    %23 = vector.broadcast %cst_23 : f32 to vector<16x32xf32>
    %c0_24 = arith.constant 0 : index
    %c0_25 = arith.constant 0 : index
    %c0_26 = arith.constant 0 : index
    %24 = vector.load %arg1[%c0_24, %c0_25, %c0_26] : memref<4x16x16xbf16, #tpu.memory_space<vmem>>, vector<1x16x16xbf16>
    %25 = vector.shape_cast %24 : vector<1x16x16xbf16> to vector<16x16xbf16>
    %26 = arith.truncf %18 : vector<16x32xf32> to vector<16x32xbf16>
    %cst_27 = arith.constant dense<0.000000e+00> : vector<16x32xf32>
    %27 = tpu.matmul %25, %26, %cst_27 {dimension_numbers = #tpu.dot_dimension_numbers<[1], [0], [0], [1], [0, 0, 1, 1], [], []>} : vector<16x16xbf16>, vector<16x32xbf16>, vector<16x32xf32> -> vector<16x32xf32>
    %28 = arith.truncf %27 : vector<16x32xf32> to vector<16x32xbf16>
    %cst_28 = arith.constant dense<0.000000e+00> : vector<16x128xf32>
    %29 = tpu.matmul %28, %0, %cst_28 {dimension_numbers = #tpu.dot_dimension_numbers<[1], [0], [0], [1], [0, 0, 1, 1], [], []>} : vector<16x32xbf16>, vector<32x128xbf16>, vector<16x128xf32> -> vector<16x128xf32>
    %30 = arith.addf %29, %11 : vector<16x128xf32>
    %31 = vector.extract_strided_slice %30 {offsets = [0, 0], sizes = [16, 32], strides = [1, 1]} : vector<16x128xf32> to vector<16x32xf32>
    %32 = arith.negf %31 : vector<16x32xf32>
    %33 = math.exp %32 : vector<16x32xf32>
    %cst_29 = arith.constant 1.000000e+00 : f32
    %34 = vector.broadcast %cst_29 : f32 to vector<16x32xf32>
    %35 = arith.addf %34, %33 : vector<16x32xf32>
    %36 = arith.divf %34, %35 : vector<16x32xf32>
    %37 = vector.extract_strided_slice %30 {offsets = [0, 32], sizes = [16, 32], strides = [1, 1]} : vector<16x128xf32> to vector<16x32xf32>
    %38 = arith.negf %37 : vector<16x32xf32>
    %39 = math.exp %38 : vector<16x32xf32>
    %cst_30 = arith.constant 1.000000e+00 : f32
    %40 = vector.broadcast %cst_30 : f32 to vector<16x32xf32>
    %41 = arith.addf %40, %39 : vector<16x32xf32>
    %42 = arith.divf %40, %41 : vector<16x32xf32>
    %43 = vector.extract_strided_slice %30 {offsets = [0, 64], sizes = [16, 32], strides = [1, 1]} : vector<16x128xf32> to vector<16x32xf32>
    %44 = math.tanh %43 : vector<16x32xf32>
    %45 = vector.extract_strided_slice %30 {offsets = [0, 96], sizes = [16, 32], strides = [1, 1]} : vector<16x128xf32> to vector<16x32xf32>
    %46 = arith.negf %45 : vector<16x32xf32>
    %47 = math.exp %46 : vector<16x32xf32>
    %cst_31 = arith.constant 1.000000e+00 : f32
    %48 = vector.broadcast %cst_31 : f32 to vector<16x32xf32>
    %49 = arith.addf %48, %47 : vector<16x32xf32>
    %50 = arith.divf %48, %49 : vector<16x32xf32>
    %51 = arith.mulf %42, %19 : vector<16x32xf32>
    %52 = arith.mulf %36, %44 : vector<16x32xf32>
    %53 = arith.addf %51, %52 : vector<16x32xf32>
    %54 = math.tanh %53 : vector<16x32xf32>
    %55 = arith.mulf %50, %54 : vector<16x32xf32>
    %c0_32 = arith.constant 0 : index
    %c0_33 = arith.constant 0 : index
    %c0_34 = arith.constant 0 : index
    %56 = vector.load %arg2[%c0_32, %c0_33, %c0_34] : memref<4x16x8xbf16, #tpu.memory_space<vmem>>, vector<1x16x8xbf16>
    %57 = vector.shape_cast %56 : vector<1x16x8xbf16> to vector<16x8xbf16>
    %cst_35 = arith.constant dense<0.000000e+00> : vector<16x128xf32>
    %58 = tpu.matmul %57, %2, %cst_35 {dimension_numbers = #tpu.dot_dimension_numbers<[1], [0], [0], [1], [0, 0, 1, 1], [], []>} : vector<16x8xbf16>, vector<8x128xbf16>, vector<16x128xf32> -> vector<16x128xf32>
    %59 = arith.truncf %20 : vector<16x32xf32> to vector<16x32xbf16>
    %cst_36 = arith.constant dense<0.000000e+00> : vector<16x128xf32>
    %60 = tpu.matmul %59, %3, %cst_36 {dimension_numbers = #tpu.dot_dimension_numbers<[1], [0], [0], [1], [0, 0, 1, 1], [], []>} : vector<16x32xbf16>, vector<32x128xbf16>, vector<16x128xf32> -> vector<16x128xf32>
    %61 = arith.addf %58, %60 : vector<16x128xf32>
    %62 = arith.addf %61, %13 : vector<16x128xf32>
    %63 = vector.extract_strided_slice %62 {offsets = [0, 0], sizes = [16, 32], strides = [1, 1]} : vector<16x128xf32> to vector<16x32xf32>
    %64 = arith.negf %63 : vector<16x32xf32>
    %65 = math.exp %64 : vector<16x32xf32>
    %cst_37 = arith.constant 1.000000e+00 : f32
    %66 = vector.broadcast %cst_37 : f32 to vector<16x32xf32>
    %67 = arith.addf %66, %65 : vector<16x32xf32>
    %68 = arith.divf %66, %67 : vector<16x32xf32>
    %69 = vector.extract_strided_slice %62 {offsets = [0, 32], sizes = [16, 32], strides = [1, 1]} : vector<16x128xf32> to vector<16x32xf32>
    %70 = arith.negf %69 : vector<16x32xf32>
    %71 = math.exp %70 : vector<16x32xf32>
    %cst_38 = arith.constant 1.000000e+00 : f32
    %72 = vector.broadcast %cst_38 : f32 to vector<16x32xf32>
    %73 = arith.addf %72, %71 : vector<16x32xf32>
    %74 = arith.divf %72, %73 : vector<16x32xf32>
    %75 = vector.extract_strided_slice %62 {offsets = [0, 64], sizes = [16, 32], strides = [1, 1]} : vector<16x128xf32> to vector<16x32xf32>
    %76 = math.tanh %75 : vector<16x32xf32>
    %77 = vector.extract_strided_slice %62 {offsets = [0, 96], sizes = [16, 32], strides = [1, 1]} : vector<16x128xf32> to vector<16x32xf32>
    %78 = arith.negf %77 : vector<16x32xf32>
    %79 = math.exp %78 : vector<16x32xf32>
    %cst_39 = arith.constant 1.000000e+00 : f32
    %80 = vector.broadcast %cst_39 : f32 to vector<16x32xf32>
    %81 = arith.addf %80, %79 : vector<16x32xf32>
    %82 = arith.divf %80, %81 : vector<16x32xf32>
    %83 = arith.mulf %74, %21 : vector<16x32xf32>
    %84 = arith.mulf %68, %76 : vector<16x32xf32>
    %85 = arith.addf %83, %84 : vector<16x32xf32>
    %86 = math.tanh %85 : vector<16x32xf32>
    %87 = arith.mulf %82, %86 : vector<16x32xf32>
    %88 = tpu.concatenate %87, %22 in 1 : vector<16x32xf32>, vector<16x32xf32> -> vector<16x64xf32>
    %89 = arith.truncf %88 : vector<16x64xf32> to vector<16x64xbf16>
    %cst_40 = arith.constant dense<0.000000e+00> : vector<16x128xf32>
    %90 = tpu.matmul %89, %5, %cst_40 {dimension_numbers = #tpu.dot_dimension_numbers<[1], [0], [0], [1], [0, 0, 1, 1], [], []>} : vector<16x64xbf16>, vector<64x128xbf16>, vector<16x128xf32> -> vector<16x128xf32>
    %91 = arith.addf %90, %15 : vector<16x128xf32>
    %92 = vector.extract_strided_slice %91 {offsets = [0, 0], sizes = [16, 32], strides = [1, 1]} : vector<16x128xf32> to vector<16x32xf32>
    %93 = arith.negf %92 : vector<16x32xf32>
    %94 = math.exp %93 : vector<16x32xf32>
    %cst_41 = arith.constant 1.000000e+00 : f32
    %95 = vector.broadcast %cst_41 : f32 to vector<16x32xf32>
    %96 = arith.addf %95, %94 : vector<16x32xf32>
    %97 = arith.divf %95, %96 : vector<16x32xf32>
    %98 = vector.extract_strided_slice %91 {offsets = [0, 32], sizes = [16, 32], strides = [1, 1]} : vector<16x128xf32> to vector<16x32xf32>
    %99 = arith.negf %98 : vector<16x32xf32>
    %100 = math.exp %99 : vector<16x32xf32>
    %cst_42 = arith.constant 1.000000e+00 : f32
    %101 = vector.broadcast %cst_42 : f32 to vector<16x32xf32>
    %102 = arith.addf %101, %100 : vector<16x32xf32>
    %103 = arith.divf %101, %102 : vector<16x32xf32>
    %104 = vector.extract_strided_slice %91 {offsets = [0, 64], sizes = [16, 32], strides = [1, 1]} : vector<16x128xf32> to vector<16x32xf32>
    %105 = math.tanh %104 : vector<16x32xf32>
    %106 = vector.extract_strided_slice %91 {offsets = [0, 96], sizes = [16, 32], strides = [1, 1]} : vector<16x128xf32> to vector<16x32xf32>
    %107 = arith.negf %106 : vector<16x32xf32>
    %108 = math.exp %107 : vector<16x32xf32>
    %cst_43 = arith.constant 1.000000e+00 : f32
    %109 = vector.broadcast %cst_43 : f32 to vector<16x32xf32>
    %110 = arith.addf %109, %108 : vector<16x32xf32>
    %111 = arith.divf %109, %110 : vector<16x32xf32>
    %112 = arith.mulf %103, %23 : vector<16x32xf32>
    %113 = arith.mulf %97, %105 : vector<16x32xf32>
    %114 = arith.addf %112, %113 : vector<16x32xf32>
    %115 = math.tanh %114 : vector<16x32xf32>
    %116 = arith.mulf %111, %115 : vector<16x32xf32>
    %c1 = arith.constant 1 : index
    %c0_44 = arith.constant 0 : index
    %c0_45 = arith.constant 0 : index
    %117 = vector.load %arg1[%c1, %c0_44, %c0_45] : memref<4x16x16xbf16, #tpu.memory_space<vmem>>, vector<1x16x16xbf16>
    %118 = vector.shape_cast %117 : vector<1x16x16xbf16> to vector<16x16xbf16>
    %119 = arith.truncf %55 : vector<16x32xf32> to vector<16x32xbf16>
    %cst_46 = arith.constant dense<0.000000e+00> : vector<16x32xf32>
    %120 = tpu.matmul %118, %119, %cst_46 {dimension_numbers = #tpu.dot_dimension_numbers<[1], [0], [0], [1], [0, 0, 1, 1], [], []>} : vector<16x16xbf16>, vector<16x32xbf16>, vector<16x32xf32> -> vector<16x32xf32>
    %121 = arith.truncf %120 : vector<16x32xf32> to vector<16x32xbf16>
    %cst_47 = arith.constant dense<0.000000e+00> : vector<16x128xf32>
    %122 = tpu.matmul %121, %0, %cst_47 {dimension_numbers = #tpu.dot_dimension_numbers<[1], [0], [0], [1], [0, 0, 1, 1], [], []>} : vector<16x32xbf16>, vector<32x128xbf16>, vector<16x128xf32> -> vector<16x128xf32>
    %123 = arith.addf %122, %11 : vector<16x128xf32>
    %124 = vector.extract_strided_slice %123 {offsets = [0, 0], sizes = [16, 32], strides = [1, 1]} : vector<16x128xf32> to vector<16x32xf32>
    %125 = arith.negf %124 : vector<16x32xf32>
    %126 = math.exp %125 : vector<16x32xf32>
    %cst_48 = arith.constant 1.000000e+00 : f32
    %127 = vector.broadcast %cst_48 : f32 to vector<16x32xf32>
    %128 = arith.addf %127, %126 : vector<16x32xf32>
    %129 = arith.divf %127, %128 : vector<16x32xf32>
    %130 = vector.extract_strided_slice %123 {offsets = [0, 32], sizes = [16, 32], strides = [1, 1]} : vector<16x128xf32> to vector<16x32xf32>
    %131 = arith.negf %130 : vector<16x32xf32>
    %132 = math.exp %131 : vector<16x32xf32>
    %cst_49 = arith.constant 1.000000e+00 : f32
    %133 = vector.broadcast %cst_49 : f32 to vector<16x32xf32>
    %134 = arith.addf %133, %132 : vector<16x32xf32>
    %135 = arith.divf %133, %134 : vector<16x32xf32>
    %136 = vector.extract_strided_slice %123 {offsets = [0, 64], sizes = [16, 32], strides = [1, 1]} : vector<16x128xf32> to vector<16x32xf32>
    %137 = math.tanh %136 : vector<16x32xf32>
    %138 = vector.extract_strided_slice %123 {offsets = [0, 96], sizes = [16, 32], strides = [1, 1]} : vector<16x128xf32> to vector<16x32xf32>
    %139 = arith.negf %138 : vector<16x32xf32>
    %140 = math.exp %139 : vector<16x32xf32>
    %cst_50 = arith.constant 1.000000e+00 : f32
    %141 = vector.broadcast %cst_50 : f32 to vector<16x32xf32>
    %142 = arith.addf %141, %140 : vector<16x32xf32>
    %143 = arith.divf %141, %142 : vector<16x32xf32>
    %144 = arith.mulf %135, %53 : vector<16x32xf32>
    %145 = arith.mulf %129, %137 : vector<16x32xf32>
    %146 = arith.addf %144, %145 : vector<16x32xf32>
    %147 = math.tanh %146 : vector<16x32xf32>
    %148 = arith.mulf %143, %147 : vector<16x32xf32>
    %c1_51 = arith.constant 1 : index
    %c0_52 = arith.constant 0 : index
    %c0_53 = arith.constant 0 : index
    %149 = vector.load %arg2[%c1_51, %c0_52, %c0_53] : memref<4x16x8xbf16, #tpu.memory_space<vmem>>, vector<1x16x8xbf16>
    %150 = vector.shape_cast %149 : vector<1x16x8xbf16> to vector<16x8xbf16>
    %cst_54 = arith.constant dense<0.000000e+00> : vector<16x128xf32>
    %151 = tpu.matmul %150, %2, %cst_54 {dimension_numbers = #tpu.dot_dimension_numbers<[1], [0], [0], [1], [0, 0, 1, 1], [], []>} : vector<16x8xbf16>, vector<8x128xbf16>, vector<16x128xf32> -> vector<16x128xf32>
    %152 = arith.truncf %87 : vector<16x32xf32> to vector<16x32xbf16>
    %cst_55 = arith.constant dense<0.000000e+00> : vector<16x128xf32>
    %153 = tpu.matmul %152, %3, %cst_55 {dimension_numbers = #tpu.dot_dimension_numbers<[1], [0], [0], [1], [0, 0, 1, 1], [], []>} : vector<16x32xbf16>, vector<32x128xbf16>, vector<16x128xf32> -> vector<16x128xf32>
    %154 = arith.addf %151, %153 : vector<16x128xf32>
    %155 = arith.addf %154, %13 : vector<16x128xf32>
    %156 = vector.extract_strided_slice %155 {offsets = [0, 0], sizes = [16, 32], strides = [1, 1]} : vector<16x128xf32> to vector<16x32xf32>
    %157 = arith.negf %156 : vector<16x32xf32>
    %158 = math.exp %157 : vector<16x32xf32>
    %cst_56 = arith.constant 1.000000e+00 : f32
    %159 = vector.broadcast %cst_56 : f32 to vector<16x32xf32>
    %160 = arith.addf %159, %158 : vector<16x32xf32>
    %161 = arith.divf %159, %160 : vector<16x32xf32>
    %162 = vector.extract_strided_slice %155 {offsets = [0, 32], sizes = [16, 32], strides = [1, 1]} : vector<16x128xf32> to vector<16x32xf32>
    %163 = arith.negf %162 : vector<16x32xf32>
    %164 = math.exp %163 : vector<16x32xf32>
    %cst_57 = arith.constant 1.000000e+00 : f32
    %165 = vector.broadcast %cst_57 : f32 to vector<16x32xf32>
    %166 = arith.addf %165, %164 : vector<16x32xf32>
    %167 = arith.divf %165, %166 : vector<16x32xf32>
    %168 = vector.extract_strided_slice %155 {offsets = [0, 64], sizes = [16, 32], strides = [1, 1]} : vector<16x128xf32> to vector<16x32xf32>
    %169 = math.tanh %168 : vector<16x32xf32>
    %170 = vector.extract_strided_slice %155 {offsets = [0, 96], sizes = [16, 32], strides = [1, 1]} : vector<16x128xf32> to vector<16x32xf32>
    %171 = arith.negf %170 : vector<16x32xf32>
    %172 = math.exp %171 : vector<16x32xf32>
    %cst_58 = arith.constant 1.000000e+00 : f32
    %173 = vector.broadcast %cst_58 : f32 to vector<16x32xf32>
    %174 = arith.addf %173, %172 : vector<16x32xf32>
    %175 = arith.divf %173, %174 : vector<16x32xf32>
    %176 = arith.mulf %167, %85 : vector<16x32xf32>
    %177 = arith.mulf %161, %169 : vector<16x32xf32>
    %178 = arith.addf %176, %177 : vector<16x32xf32>
    %179 = math.tanh %178 : vector<16x32xf32>
    %180 = arith.mulf %175, %179 : vector<16x32xf32>
    %181 = tpu.concatenate %180, %116 in 1 : vector<16x32xf32>, vector<16x32xf32> -> vector<16x64xf32>
    %182 = arith.truncf %181 : vector<16x64xf32> to vector<16x64xbf16>
    %cst_59 = arith.constant dense<0.000000e+00> : vector<16x128xf32>
    %183 = tpu.matmul %182, %5, %cst_59 {dimension_numbers = #tpu.dot_dimension_numbers<[1], [0], [0], [1], [0, 0, 1, 1], [], []>} : vector<16x64xbf16>, vector<64x128xbf16>, vector<16x128xf32> -> vector<16x128xf32>
    %184 = arith.addf %183, %15 : vector<16x128xf32>
    %185 = vector.extract_strided_slice %184 {offsets = [0, 0], sizes = [16, 32], strides = [1, 1]} : vector<16x128xf32> to vector<16x32xf32>
    %186 = arith.negf %185 : vector<16x32xf32>
    %187 = math.exp %186 : vector<16x32xf32>
    %cst_60 = arith.constant 1.000000e+00 : f32
    %188 = vector.broadcast %cst_60 : f32 to vector<16x32xf32>
    %189 = arith.addf %188, %187 : vector<16x32xf32>
    %190 = arith.divf %188, %189 : vector<16x32xf32>
    %191 = vector.extract_strided_slice %184 {offsets = [0, 32], sizes = [16, 32], strides = [1, 1]} : vector<16x128xf32> to vector<16x32xf32>
    %192 = arith.negf %191 : vector<16x32xf32>
    %193 = math.exp %192 : vector<16x32xf32>
    %cst_61 = arith.constant 1.000000e+00 : f32
    %194 = vector.broadcast %cst_61 : f32 to vector<16x32xf32>
    %195 = arith.addf %194, %193 : vector<16x32xf32>
    %196 = arith.divf %194, %195 : vector<16x32xf32>
    %197 = vector.extract_strided_slice %184 {offsets = [0, 64], sizes = [16, 32], strides = [1, 1]} : vector<16x128xf32> to vector<16x32xf32>
    %198 = math.tanh %197 : vector<16x32xf32>
    %199 = vector.extract_strided_slice %184 {offsets = [0, 96], sizes = [16, 32], strides = [1, 1]} : vector<16x128xf32> to vector<16x32xf32>
    %200 = arith.negf %199 : vector<16x32xf32>
    %201 = math.exp %200 : vector<16x32xf32>
    %cst_62 = arith.constant 1.000000e+00 : f32
    %202 = vector.broadcast %cst_62 : f32 to vector<16x32xf32>
    %203 = arith.addf %202, %201 : vector<16x32xf32>
    %204 = arith.divf %202, %203 : vector<16x32xf32>
    %205 = arith.mulf %196, %114 : vector<16x32xf32>
    %206 = arith.mulf %190, %198 : vector<16x32xf32>
    %207 = arith.addf %205, %206 : vector<16x32xf32>
    %208 = math.tanh %207 : vector<16x32xf32>
    %209 = arith.mulf %204, %208 : vector<16x32xf32>
    %c2 = arith.constant 2 : index
    %c0_63 = arith.constant 0 : index
    %c0_64 = arith.constant 0 : index
    %210 = vector.load %arg1[%c2, %c0_63, %c0_64] : memref<4x16x16xbf16, #tpu.memory_space<vmem>>, vector<1x16x16xbf16>
    %211 = vector.shape_cast %210 : vector<1x16x16xbf16> to vector<16x16xbf16>
    %212 = arith.truncf %148 : vector<16x32xf32> to vector<16x32xbf16>
    %cst_65 = arith.constant dense<0.000000e+00> : vector<16x32xf32>
    %213 = tpu.matmul %211, %212, %cst_65 {dimension_numbers = #tpu.dot_dimension_numbers<[1], [0], [0], [1], [0, 0, 1, 1], [], []>} : vector<16x16xbf16>, vector<16x32xbf16>, vector<16x32xf32> -> vector<16x32xf32>
    %214 = arith.truncf %213 : vector<16x32xf32> to vector<16x32xbf16>
    %cst_66 = arith.constant dense<0.000000e+00> : vector<16x128xf32>
    %215 = tpu.matmul %214, %0, %cst_66 {dimension_numbers = #tpu.dot_dimension_numbers<[1], [0], [0], [1], [0, 0, 1, 1], [], []>} : vector<16x32xbf16>, vector<32x128xbf16>, vector<16x128xf32> -> vector<16x128xf32>
    %216 = arith.addf %215, %11 : vector<16x128xf32>
    %217 = vector.extract_strided_slice %216 {offsets = [0, 0], sizes = [16, 32], strides = [1, 1]} : vector<16x128xf32> to vector<16x32xf32>
    %218 = arith.negf %217 : vector<16x32xf32>
    %219 = math.exp %218 : vector<16x32xf32>
    %cst_67 = arith.constant 1.000000e+00 : f32
    %220 = vector.broadcast %cst_67 : f32 to vector<16x32xf32>
    %221 = arith.addf %220, %219 : vector<16x32xf32>
    %222 = arith.divf %220, %221 : vector<16x32xf32>
    %223 = vector.extract_strided_slice %216 {offsets = [0, 32], sizes = [16, 32], strides = [1, 1]} : vector<16x128xf32> to vector<16x32xf32>
    %224 = arith.negf %223 : vector<16x32xf32>
    %225 = math.exp %224 : vector<16x32xf32>
    %cst_68 = arith.constant 1.000000e+00 : f32
    %226 = vector.broadcast %cst_68 : f32 to vector<16x32xf32>
    %227 = arith.addf %226, %225 : vector<16x32xf32>
    %228 = arith.divf %226, %227 : vector<16x32xf32>
    %229 = vector.extract_strided_slice %216 {offsets = [0, 64], sizes = [16, 32], strides = [1, 1]} : vector<16x128xf32> to vector<16x32xf32>
    %230 = math.tanh %229 : vector<16x32xf32>
    %231 = vector.extract_strided_slice %216 {offsets = [0, 96], sizes = [16, 32], strides = [1, 1]} : vector<16x128xf32> to vector<16x32xf32>
    %232 = arith.negf %231 : vector<16x32xf32>
    %233 = math.exp %232 : vector<16x32xf32>
    %cst_69 = arith.constant 1.000000e+00 : f32
    %234 = vector.broadcast %cst_69 : f32 to vector<16x32xf32>
    %235 = arith.addf %234, %233 : vector<16x32xf32>
    %236 = arith.divf %234, %235 : vector<16x32xf32>
    %237 = arith.mulf %228, %146 : vector<16x32xf32>
    %238 = arith.mulf %222, %230 : vector<16x32xf32>
    %239 = arith.addf %237, %238 : vector<16x32xf32>
    %240 = math.tanh %239 : vector<16x32xf32>
    %241 = arith.mulf %236, %240 : vector<16x32xf32>
    %c2_70 = arith.constant 2 : index
    %c0_71 = arith.constant 0 : index
    %c0_72 = arith.constant 0 : index
    %242 = vector.load %arg2[%c2_70, %c0_71, %c0_72] : memref<4x16x8xbf16, #tpu.memory_space<vmem>>, vector<1x16x8xbf16>
    %243 = vector.shape_cast %242 : vector<1x16x8xbf16> to vector<16x8xbf16>
    %cst_73 = arith.constant dense<0.000000e+00> : vector<16x128xf32>
    %244 = tpu.matmul %243, %2, %cst_73 {dimension_numbers = #tpu.dot_dimension_numbers<[1], [0], [0], [1], [0, 0, 1, 1], [], []>} : vector<16x8xbf16>, vector<8x128xbf16>, vector<16x128xf32> -> vector<16x128xf32>
    %245 = arith.truncf %180 : vector<16x32xf32> to vector<16x32xbf16>
    %cst_74 = arith.constant dense<0.000000e+00> : vector<16x128xf32>
    %246 = tpu.matmul %245, %3, %cst_74 {dimension_numbers = #tpu.dot_dimension_numbers<[1], [0], [0], [1], [0, 0, 1, 1], [], []>} : vector<16x32xbf16>, vector<32x128xbf16>, vector<16x128xf32> -> vector<16x128xf32>
    %247 = arith.addf %244, %246 : vector<16x128xf32>
    %248 = arith.addf %247, %13 : vector<16x128xf32>
    %249 = vector.extract_strided_slice %248 {offsets = [0, 0], sizes = [16, 32], strides = [1, 1]} : vector<16x128xf32> to vector<16x32xf32>
    %250 = arith.negf %249 : vector<16x32xf32>
    %251 = math.exp %250 : vector<16x32xf32>
    %cst_75 = arith.constant 1.000000e+00 : f32
    %252 = vector.broadcast %cst_75 : f32 to vector<16x32xf32>
    %253 = arith.addf %252, %251 : vector<16x32xf32>
    %254 = arith.divf %252, %253 : vector<16x32xf32>
    %255 = vector.extract_strided_slice %248 {offsets = [0, 32], sizes = [16, 32], strides = [1, 1]} : vector<16x128xf32> to vector<16x32xf32>
    %256 = arith.negf %255 : vector<16x32xf32>
    %257 = math.exp %256 : vector<16x32xf32>
    %cst_76 = arith.constant 1.000000e+00 : f32
    %258 = vector.broadcast %cst_76 : f32 to vector<16x32xf32>
    %259 = arith.addf %258, %257 : vector<16x32xf32>
    %260 = arith.divf %258, %259 : vector<16x32xf32>
    %261 = vector.extract_strided_slice %248 {offsets = [0, 64], sizes = [16, 32], strides = [1, 1]} : vector<16x128xf32> to vector<16x32xf32>
    %262 = math.tanh %261 : vector<16x32xf32>
    %263 = vector.extract_strided_slice %248 {offsets = [0, 96], sizes = [16, 32], strides = [1, 1]} : vector<16x128xf32> to vector<16x32xf32>
    %264 = arith.negf %263 : vector<16x32xf32>
    %265 = math.exp %264 : vector<16x32xf32>
    %cst_77 = arith.constant 1.000000e+00 : f32
    %266 = vector.broadcast %cst_77 : f32 to vector<16x32xf32>
    %267 = arith.addf %266, %265 : vector<16x32xf32>
    %268 = arith.divf %266, %267 : vector<16x32xf32>
    %269 = arith.mulf %260, %178 : vector<16x32xf32>
    %270 = arith.mulf %254, %262 : vector<16x32xf32>
    %271 = arith.addf %269, %270 : vector<16x32xf32>
    %272 = math.tanh %271 : vector<16x32xf32>
    %273 = arith.mulf %268, %272 : vector<16x32xf32>
    %274 = tpu.concatenate %273, %209 in 1 : vector<16x32xf32>, vector<16x32xf32> -> vector<16x64xf32>
    %275 = arith.truncf %274 : vector<16x64xf32> to vector<16x64xbf16>
    %cst_78 = arith.constant dense<0.000000e+00> : vector<16x128xf32>
    %276 = tpu.matmul %275, %5, %cst_78 {dimension_numbers = #tpu.dot_dimension_numbers<[1], [0], [0], [1], [0, 0, 1, 1], [], []>} : vector<16x64xbf16>, vector<64x128xbf16>, vector<16x128xf32> -> vector<16x128xf32>
    %277 = arith.addf %276, %15 : vector<16x128xf32>
    %278 = vector.extract_strided_slice %277 {offsets = [0, 0], sizes = [16, 32], strides = [1, 1]} : vector<16x128xf32> to vector<16x32xf32>
    %279 = arith.negf %278 : vector<16x32xf32>
    %280 = math.exp %279 : vector<16x32xf32>
    %cst_79 = arith.constant 1.000000e+00 : f32
    %281 = vector.broadcast %cst_79 : f32 to vector<16x32xf32>
    %282 = arith.addf %281, %280 : vector<16x32xf32>
    %283 = arith.divf %281, %282 : vector<16x32xf32>
    %284 = vector.extract_strided_slice %277 {offsets = [0, 32], sizes = [16, 32], strides = [1, 1]} : vector<16x128xf32> to vector<16x32xf32>
    %285 = arith.negf %284 : vector<16x32xf32>
    %286 = math.exp %285 : vector<16x32xf32>
    %cst_80 = arith.constant 1.000000e+00 : f32
    %287 = vector.broadcast %cst_80 : f32 to vector<16x32xf32>
    %288 = arith.addf %287, %286 : vector<16x32xf32>
    %289 = arith.divf %287, %288 : vector<16x32xf32>
    %290 = vector.extract_strided_slice %277 {offsets = [0, 64], sizes = [16, 32], strides = [1, 1]} : vector<16x128xf32> to vector<16x32xf32>
    %291 = math.tanh %290 : vector<16x32xf32>
    %292 = vector.extract_strided_slice %277 {offsets = [0, 96], sizes = [16, 32], strides = [1, 1]} : vector<16x128xf32> to vector<16x32xf32>
    %293 = arith.negf %292 : vector<16x32xf32>
    %294 = math.exp %293 : vector<16x32xf32>
    %cst_81 = arith.constant 1.000000e+00 : f32
    %295 = vector.broadcast %cst_81 : f32 to vector<16x32xf32>
    %296 = arith.addf %295, %294 : vector<16x32xf32>
    %297 = arith.divf %295, %296 : vector<16x32xf32>
    %298 = arith.mulf %289, %207 : vector<16x32xf32>
    %299 = arith.mulf %283, %291 : vector<16x32xf32>
    %300 = arith.addf %298, %299 : vector<16x32xf32>
    %301 = math.tanh %300 : vector<16x32xf32>
    %302 = arith.mulf %297, %301 : vector<16x32xf32>
    %c3 = arith.constant 3 : index
    %c0_82 = arith.constant 0 : index
    %c0_83 = arith.constant 0 : index
    %303 = vector.load %arg1[%c3, %c0_82, %c0_83] : memref<4x16x16xbf16, #tpu.memory_space<vmem>>, vector<1x16x16xbf16>
    %304 = vector.shape_cast %303 : vector<1x16x16xbf16> to vector<16x16xbf16>
    %305 = arith.truncf %241 : vector<16x32xf32> to vector<16x32xbf16>
    %cst_84 = arith.constant dense<0.000000e+00> : vector<16x32xf32>
    %306 = tpu.matmul %304, %305, %cst_84 {dimension_numbers = #tpu.dot_dimension_numbers<[1], [0], [0], [1], [0, 0, 1, 1], [], []>} : vector<16x16xbf16>, vector<16x32xbf16>, vector<16x32xf32> -> vector<16x32xf32>
    %307 = arith.truncf %306 : vector<16x32xf32> to vector<16x32xbf16>
    %cst_85 = arith.constant dense<0.000000e+00> : vector<16x128xf32>
    %308 = tpu.matmul %307, %0, %cst_85 {dimension_numbers = #tpu.dot_dimension_numbers<[1], [0], [0], [1], [0, 0, 1, 1], [], []>} : vector<16x32xbf16>, vector<32x128xbf16>, vector<16x128xf32> -> vector<16x128xf32>
    %309 = arith.addf %308, %11 : vector<16x128xf32>
    %310 = vector.extract_strided_slice %309 {offsets = [0, 0], sizes = [16, 32], strides = [1, 1]} : vector<16x128xf32> to vector<16x32xf32>
    %311 = arith.negf %310 : vector<16x32xf32>
    %312 = math.exp %311 : vector<16x32xf32>
    %cst_86 = arith.constant 1.000000e+00 : f32
    %313 = vector.broadcast %cst_86 : f32 to vector<16x32xf32>
    %314 = arith.addf %313, %312 : vector<16x32xf32>
    %315 = arith.divf %313, %314 : vector<16x32xf32>
    %316 = vector.extract_strided_slice %309 {offsets = [0, 32], sizes = [16, 32], strides = [1, 1]} : vector<16x128xf32> to vector<16x32xf32>
    %317 = arith.negf %316 : vector<16x32xf32>
    %318 = math.exp %317 : vector<16x32xf32>
    %cst_87 = arith.constant 1.000000e+00 : f32
    %319 = vector.broadcast %cst_87 : f32 to vector<16x32xf32>
    %320 = arith.addf %319, %318 : vector<16x32xf32>
    %321 = arith.divf %319, %320 : vector<16x32xf32>
    %322 = vector.extract_strided_slice %309 {offsets = [0, 64], sizes = [16, 32], strides = [1, 1]} : vector<16x128xf32> to vector<16x32xf32>
    %323 = math.tanh %322 : vector<16x32xf32>
    %324 = vector.extract_strided_slice %309 {offsets = [0, 96], sizes = [16, 32], strides = [1, 1]} : vector<16x128xf32> to vector<16x32xf32>
    %325 = arith.negf %324 : vector<16x32xf32>
    %326 = math.exp %325 : vector<16x32xf32>
    %cst_88 = arith.constant 1.000000e+00 : f32
    %327 = vector.broadcast %cst_88 : f32 to vector<16x32xf32>
    %328 = arith.addf %327, %326 : vector<16x32xf32>
    %329 = arith.divf %327, %328 : vector<16x32xf32>
    %330 = arith.mulf %321, %239 : vector<16x32xf32>
    %331 = arith.mulf %315, %323 : vector<16x32xf32>
    %332 = arith.addf %330, %331 : vector<16x32xf32>
    %333 = math.tanh %332 : vector<16x32xf32>
    %334 = arith.mulf %329, %333 : vector<16x32xf32>
    %c3_89 = arith.constant 3 : index
    %c0_90 = arith.constant 0 : index
    %c0_91 = arith.constant 0 : index
    %335 = vector.load %arg2[%c3_89, %c0_90, %c0_91] : memref<4x16x8xbf16, #tpu.memory_space<vmem>>, vector<1x16x8xbf16>
    %336 = vector.shape_cast %335 : vector<1x16x8xbf16> to vector<16x8xbf16>
    %cst_92 = arith.constant dense<0.000000e+00> : vector<16x128xf32>
    %337 = tpu.matmul %336, %2, %cst_92 {dimension_numbers = #tpu.dot_dimension_numbers<[1], [0], [0], [1], [0, 0, 1, 1], [], []>} : vector<16x8xbf16>, vector<8x128xbf16>, vector<16x128xf32> -> vector<16x128xf32>
    %338 = arith.truncf %273 : vector<16x32xf32> to vector<16x32xbf16>
    %cst_93 = arith.constant dense<0.000000e+00> : vector<16x128xf32>
    %339 = tpu.matmul %338, %3, %cst_93 {dimension_numbers = #tpu.dot_dimension_numbers<[1], [0], [0], [1], [0, 0, 1, 1], [], []>} : vector<16x32xbf16>, vector<32x128xbf16>, vector<16x128xf32> -> vector<16x128xf32>
    %340 = arith.addf %337, %339 : vector<16x128xf32>
    %341 = arith.addf %340, %13 : vector<16x128xf32>
    %342 = vector.extract_strided_slice %341 {offsets = [0, 0], sizes = [16, 32], strides = [1, 1]} : vector<16x128xf32> to vector<16x32xf32>
    %343 = arith.negf %342 : vector<16x32xf32>
    %344 = math.exp %343 : vector<16x32xf32>
    %cst_94 = arith.constant 1.000000e+00 : f32
    %345 = vector.broadcast %cst_94 : f32 to vector<16x32xf32>
    %346 = arith.addf %345, %344 : vector<16x32xf32>
    %347 = arith.divf %345, %346 : vector<16x32xf32>
    %348 = vector.extract_strided_slice %341 {offsets = [0, 32], sizes = [16, 32], strides = [1, 1]} : vector<16x128xf32> to vector<16x32xf32>
    %349 = arith.negf %348 : vector<16x32xf32>
    %350 = math.exp %349 : vector<16x32xf32>
    %cst_95 = arith.constant 1.000000e+00 : f32
    %351 = vector.broadcast %cst_95 : f32 to vector<16x32xf32>
    %352 = arith.addf %351, %350 : vector<16x32xf32>
    %353 = arith.divf %351, %352 : vector<16x32xf32>
    %354 = vector.extract_strided_slice %341 {offsets = [0, 64], sizes = [16, 32], strides = [1, 1]} : vector<16x128xf32> to vector<16x32xf32>
    %355 = math.tanh %354 : vector<16x32xf32>
    %356 = vector.extract_strided_slice %341 {offsets = [0, 96], sizes = [16, 32], strides = [1, 1]} : vector<16x128xf32> to vector<16x32xf32>
    %357 = arith.negf %356 : vector<16x32xf32>
    %358 = math.exp %357 : vector<16x32xf32>
    %cst_96 = arith.constant 1.000000e+00 : f32
    %359 = vector.broadcast %cst_96 : f32 to vector<16x32xf32>
    %360 = arith.addf %359, %358 : vector<16x32xf32>
    %361 = arith.divf %359, %360 : vector<16x32xf32>
    %362 = arith.mulf %353, %271 : vector<16x32xf32>
    %363 = arith.mulf %347, %355 : vector<16x32xf32>
    %364 = arith.addf %362, %363 : vector<16x32xf32>
    %365 = math.tanh %364 : vector<16x32xf32>
    %366 = arith.mulf %361, %365 : vector<16x32xf32>
    %367 = tpu.concatenate %366, %302 in 1 : vector<16x32xf32>, vector<16x32xf32> -> vector<16x64xf32>
    %368 = arith.truncf %367 : vector<16x64xf32> to vector<16x64xbf16>
    %cst_97 = arith.constant dense<0.000000e+00> : vector<16x128xf32>
    %369 = tpu.matmul %368, %5, %cst_97 {dimension_numbers = #tpu.dot_dimension_numbers<[1], [0], [0], [1], [0, 0, 1, 1], [], []>} : vector<16x64xbf16>, vector<64x128xbf16>, vector<16x128xf32> -> vector<16x128xf32>
    %370 = arith.addf %369, %15 : vector<16x128xf32>
    %371 = vector.extract_strided_slice %370 {offsets = [0, 0], sizes = [16, 32], strides = [1, 1]} : vector<16x128xf32> to vector<16x32xf32>
    %372 = arith.negf %371 : vector<16x32xf32>
    %373 = math.exp %372 : vector<16x32xf32>
    %cst_98 = arith.constant 1.000000e+00 : f32
    %374 = vector.broadcast %cst_98 : f32 to vector<16x32xf32>
    %375 = arith.addf %374, %373 : vector<16x32xf32>
    %376 = arith.divf %374, %375 : vector<16x32xf32>
    %377 = vector.extract_strided_slice %370 {offsets = [0, 32], sizes = [16, 32], strides = [1, 1]} : vector<16x128xf32> to vector<16x32xf32>
    %378 = arith.negf %377 : vector<16x32xf32>
    %379 = math.exp %378 : vector<16x32xf32>
    %cst_99 = arith.constant 1.000000e+00 : f32
    %380 = vector.broadcast %cst_99 : f32 to vector<16x32xf32>
    %381 = arith.addf %380, %379 : vector<16x32xf32>
    %382 = arith.divf %380, %381 : vector<16x32xf32>
    %383 = vector.extract_strided_slice %370 {offsets = [0, 64], sizes = [16, 32], strides = [1, 1]} : vector<16x128xf32> to vector<16x32xf32>
    %384 = math.tanh %383 : vector<16x32xf32>
    %385 = vector.extract_strided_slice %370 {offsets = [0, 96], sizes = [16, 32], strides = [1, 1]} : vector<16x128xf32> to vector<16x32xf32>
    %386 = arith.negf %385 : vector<16x32xf32>
    %387 = math.exp %386 : vector<16x32xf32>
    %cst_100 = arith.constant 1.000000e+00 : f32
    %388 = vector.broadcast %cst_100 : f32 to vector<16x32xf32>
    %389 = arith.addf %388, %387 : vector<16x32xf32>
    %390 = arith.divf %388, %389 : vector<16x32xf32>
    %391 = arith.mulf %382, %300 : vector<16x32xf32>
    %392 = arith.mulf %376, %384 : vector<16x32xf32>
    %393 = arith.addf %391, %392 : vector<16x32xf32>
    %394 = math.tanh %393 : vector<16x32xf32>
    %395 = arith.mulf %390, %394 : vector<16x32xf32>
    %396 = arith.truncf %334 : vector<16x32xf32> to vector<16x32xbf16>
    %cst_101 = arith.constant dense<0.000000e+00> : vector<16x4xf32>
    %397 = tpu.matmul %396, %7, %cst_101 {dimension_numbers = #tpu.dot_dimension_numbers<[1], [0], [0], [1], [0, 0, 1, 1], [], []>} : vector<16x32xbf16>, vector<32x4xbf16>, vector<16x4xf32> -> vector<16x4xf32>
    %398 = arith.truncf %395 : vector<16x32xf32> to vector<16x32xbf16>
    %cst_102 = arith.constant dense<0.000000e+00> : vector<16x4xf32>
    %399 = tpu.matmul %398, %8, %cst_102 {dimension_numbers = #tpu.dot_dimension_numbers<[1], [0], [0], [1], [0, 0, 1, 1], [], []>} : vector<16x32xbf16>, vector<32x4xbf16>, vector<16x4xf32> -> vector<16x4xf32>
    %400 = arith.addf %397, %399 : vector<16x4xf32>
    %401 = arith.addf %400, %17 : vector<16x4xf32>
    %cst_103 = arith.constant dense<0xFF800000> : vector<16xf32>
    %402 = vector.multi_reduction <maximumf>, %401, %cst_103 [1] : vector<16x4xf32> to vector<16xf32>
    %403 = vector.shape_cast %402 : vector<16xf32> to vector<16x1xf32>
    %404 = vector.broadcast %403 : vector<16x1xf32> to vector<16x4xf32>
    %405 = arith.subf %401, %404 : vector<16x4xf32>
    %406 = math.exp %405 : vector<16x4xf32>
    %cst_104 = arith.constant dense<0.000000e+00> : vector<16xf32>
    %407 = vector.multi_reduction <add>, %406, %cst_104 [1] : vector<16x4xf32> to vector<16xf32>
    %408 = vector.shape_cast %407 : vector<16xf32> to vector<16x1xf32>
    %409 = math.log %408 : vector<16x1xf32>
    %410 = vector.broadcast %409 : vector<16x1xf32> to vector<16x4xf32>
    %411 = arith.subf %405, %410 : vector<16x4xf32>
    %c0_105 = arith.constant 0 : index
    %c0_106 = arith.constant 0 : index
    %412 = vector.load %arg13[%c0_105, %c0_106] : memref<16x4xf32, #tpu.memory_space<vmem>>, vector<16x4xf32>
    tpu.vector_store %arg13[%c0_105, %c0_106], %411 {strides = array<i32>} : memref<16x4xf32, #tpu.memory_space<vmem>>, vector<16x4xf32>,
    %c0_107 = arith.constant 0 : index
    %c0_108 = arith.constant 0 : index
    %413 = vector.load %arg14[%c0_107, %c0_108] : memref<16x32xf32, #tpu.memory_space<vmem>>, vector<16x32xf32>
    tpu.vector_store %arg14[%c0_107, %c0_108], %334 {strides = array<i32>} : memref<16x32xf32, #tpu.memory_space<vmem>>, vector<16x32xf32>,
    %c0_109 = arith.constant 0 : index
    %c0_110 = arith.constant 0 : index
    %414 = vector.load %arg15[%c0_109, %c0_110] : memref<16x32xf32, #tpu.memory_space<vmem>>, vector<16x32xf32>
    tpu.vector_store %arg15[%c0_109, %c0_110], %332 {strides = array<i32>} : memref<16x32xf32, #tpu.memory_space<vmem>>, vector<16x32xf32>,
    %c0_111 = arith.constant 0 : index
    %c0_112 = arith.constant 0 : index
    %415 = vector.load %arg16[%c0_111, %c0_112] : memref<16x32xf32, #tpu.memory_space<vmem>>, vector<16x32xf32>
    tpu.vector_store %arg16[%c0_111, %c0_112], %87 {strides = array<i32>} : memref<16x32xf32, #tpu.memory_space<vmem>>, vector<16x32xf32>,
    %c0_113 = arith.constant 0 : index
    %c0_114 = arith.constant 0 : index
    %416 = vector.load %arg17[%c0_113, %c0_114] : memref<16x32xf32, #tpu.memory_space<vmem>>, vector<16x32xf32>
    tpu.vector_store %arg17[%c0_113, %c0_114], %85 {strides = array<i32>} : memref<16x32xf32, #tpu.memory_space<vmem>>, vector<16x32xf32>,
    return
  }
  func.func @transform_0(%arg0: i32) -> (i32, i32, i32) {
    %c0_i32 = arith.constant 0 : i32
    %c0_i32_0 = arith.constant 0 : i32
    %c0_i32_1 = arith.constant 0 : i32
    %c0_i32_2 = arith.constant 0 : i32
    return %c0_i32, %c0_i32_0, %c0_i32_1 : i32, i32, i32
  }
  func.func @transform_1(%arg0: i32) -> (i32, i32, i32) {
    %c0_i32 = arith.constant 0 : i32
    %c0_i32_0 = arith.constant 0 : i32
    %c0_i32_1 = arith.constant 0 : i32
    %c0_i32_2 = arith.constant 0 : i32
    return %c0_i32, %c0_i32_0, %c0_i32_1 : i32, i32, i32
  }
  func.func @transform_2(%arg0: i32) -> (i32, i32) {
    %c0_i32 = arith.constant 0 : i32
    %c0_i32_0 = arith.constant 0 : i32
    %c0_i32_1 = arith.constant 0 : i32
    return %c0_i32, %c0_i32_0 : i32, i32
  }
  func.func @transform_3(%arg0: i32) -> (i32, i32) {
    %c0_i32 = arith.constant 0 : i32
    %c0_i32_0 = arith.constant 0 : i32
    %c0_i32_1 = arith.constant 0 : i32
    return %c0_i32, %c0_i32_0 : i32, i32
  }
  func.func @transform_4(%arg0: i32) -> (i32, i32) {
    %c0_i32 = arith.constant 0 : i32
    %c0_i32_0 = arith.constant 0 : i32
    %c0_i32_1 = arith.constant 0 : i32
    return %c0_i32, %c0_i32_0 : i32, i32
  }
  func.func @transform_5(%arg0: i32) -> (i32, i32) {
    %c0_i32 = arith.constant 0 : i32
    %c0_i32_0 = arith.constant 0 : i32
    %c0_i32_1 = arith.constant 0 : i32
    return %c0_i32, %c0_i32_0 : i32, i32
  }
  func.func @transform_6(%arg0: i32) -> (i32, i32) {
    %c0_i32 = arith.constant 0 : i32
    %c0_i32_0 = arith.constant 0 : i32
    %c0_i32_1 = arith.constant 0 : i32
    return %c0_i32, %c0_i32_0 : i32, i32
  }
  func.func @transform_7(%arg0: i32) -> (i32, i32) {
    %c0_i32 = arith.constant 0 : i32
    %c0_i32_0 = arith.constant 0 : i32
    %c0_i32_1 = arith.constant 0 : i32
    return %c0_i32, %c0_i32_0 : i32, i32
  }
  func.func @transform_8(%arg0: i32) -> (i32, i32) {
    %c0_i32 = arith.constant 0 : i32
    %c0_i32_0 = arith.constant 0 : i32
    %c0_i32_1 = arith.constant 0 : i32
    return %c0_i32, %c0_i32_0 : i32, i32
  }
  func.func @transform_9(%arg0: i32) -> (i32, i32) {
    %c0_i32 = arith.constant 0 : i32
    %c0_i32_0 = arith.constant 0 : i32
    %c0_i32_1 = arith.constant 0 : i32
    return %c0_i32, %c0_i32_0 : i32, i32
  }
  func.func @transform_10(%arg0: i32) -> (i32, i32) {
    %c0_i32 = arith.constant 0 : i32
    %c0_i32_0 = arith.constant 0 : i32
    %c0_i32_1 = arith.constant 0 : i32
    return %c0_i32, %c0_i32_0 : i32, i32
  }
  func.func @transform_11(%arg0: i32) -> (i32, i32) {
    %c0_i32 = arith.constant 0 : i32
    %c0_i32_0 = arith.constant 0 : i32
    %c0_i32_1 = arith.constant 0 : i32
    return %c0_i32, %c0_i32_0 : i32, i32
  }
  func.func @transform_12(%arg0: i32) -> (i32, i32) {
    %c0_i32 = arith.constant 0 : i32
    %c0_i32_0 = arith.constant 0 : i32
    %c0_i32_1 = arith.constant 0 : i32
    return %c0_i32, %c0_i32_0 : i32, i32
  }
  func.func @transform_13(%arg0: i32) -> (i32, i32) {
    %c0_i32 = arith.constant 0 : i32
    %c0_i32_0 = arith.constant 0 : i32
    %c0_i32_1 = arith.constant 0 : i32
    return %c0_i32, %c0_i32_0 : i32, i32
  }
  func.func @transform_14(%arg0: i32) -> (i32, i32) {
    %c0_i32 = arith.constant 0 : i32
    %c0_i32_0 = arith.constant 0 : i32
    %c0_i32_1 = arith.constant 0 : i32
    return %c0_i32, %c0_i32_0 : i32, i32
  }
  func.func @transform_15(%arg0: i32) -> (i32, i32) {
    %c0_i32 = arith.constant 0 : i32
    %c0_i32_0 = arith.constant 0 : i32
    %c0_i32_1 = arith.constant 0 : i32
    return %c0_i32, %c0_i32_0 : i32, i32
  }
  func.func @transform_16(%arg0: i32) -> (i32, i32) {
    %c0_i32 = arith.constant 0 : i32
    %c0_i32_0 = arith.constant 0 : i32
    %c0_i32_1 = arith.constant 0 : i32
    return %c0_i32, %c0_i32_0 : i32, i32
  }
}

</mosaic_0001>

<bundles_post_ra>
// kernel: rgnn_rnn_forward.1
= control target key start
LH: loop header
LB: loop body
LE: loop exit
PB: predicated region body
PF: predicated region fallthrough
CT: control target
= control target key end

     0   :  { %s2857_s0 = inlined_call_operand.vmem [shape: bf16[4,16,16], index: 0, kind: input, shape index: {}]   ;;  %s2858_s1 = inlined_call_operand.vmem [shape: bf16[4,16,8], index: 1, kind: input, shape index: {}]   ;;  %s2859_s2 = inlined_call_operand.vmem [shape: bf16[32,128], index: 2, kind: input, shape index: {}]   ;;  %s2860_s3 = inlined_call_operand.vmem [shape: f32[1,128], index: 3, kind: input, shape index: {}]   ;;  %s2861_s4 = inlined_call_operand.vmem [shape: bf16[8,128], index: 4, kind: input, shape index: {}]   ;;  %s2862_s5 = inlined_call_operand.vmem [shape: bf16[32,128], index: 5, kind: input, shape index: {}]   ;;  %s2863_s6 = inlined_call_operand.vmem [shape: f32[1,128], index: 6, kind: input, shape index: {}]   ;;  %s2864_s7 = inlined_call_operand.vmem [shape: bf16[64,128], index: 7, kind: input, shape index: {}]   ;;  %s2865_s8 = inlined_call_operand.vmem [shape: f32[1,128], index: 8, kind: input, shape index: {}]   ;;  %s2866_s9 = inlined_call_operand.vmem [shape: bf16[32,4], index: 9, kind: input, shape index: {}]   ;;  %s2867_s10 = inlined_call_operand.vmem [shape: bf16[32,4], index: 10, kind: input, shape index: {}]   ;;  %s2868_s11 = inlined_call_operand.vmem [shape: f32[1,4], index: 11, kind: input, shape index: {}]   ;;  %s2869_s12 = inlined_call_operand.vmem [shape: f32[16,4], index: 12, kind: output, shape index: {0}]   ;;  %s2870_s13 = inlined_call_operand.hbm [shape: f32[16,32], index: 13, kind: output, shape index: {1}]   ;;  %s2871_s14 = inlined_call_operand.hbm [shape: f32[16,32], index: 14, kind: output, shape index: {2}]   ;;  %s2872_s15 = inlined_call_operand.hbm [shape: f32[16,32], index: 15, kind: output, shape index: {3}]   ;;  %s2873_s16 = inlined_call_operand.hbm [shape: f32[16,32], index: 16, kind: output, shape index: {4}]  }
   0x1   :  { %2875 = sst [smem:[#allocation12_spill]] %s2857_s0 }
   0x2   :  { %22 = vsyncpa [#allocation3], 0 }
   0x3   :  { %23 = vsyncpa [#allocation5], 0  ;;  %v2354_v0 = vld [vmem:[%s2862_s5 + $0x8] sm:$0xff]  ;;  %s2876_s25 = sld [smem:[#allocation12_spill]]  ;;  %vm261_vm0 = vcmask 1043456   ;;  %v2256_v2 = vmov 0  }
   0x4   :  { %109 = vmatpush.bf16.msra.mxu0 %v2256_v2  ;;  %vm98_vm1 = vcmask 130048   ;;  %v2362_v3 = vld [vmem:[%s2862_s5] sm:$0xff]  ;;  %244 = vmatpush.bf16.msra.mxu2 %v2354_v0  ;;  %vm257_vm2 = vcmask 64512  }
   0x5   :  { %v55_v4 = vld [vmem:[%s2861_s4] sm:$0xf] }
   0x6   :  { %v2368_v5 = vsel %vm261_vm0, %v55_v4, 0  ;;  %v1896_v6 = vld [vmem:[%s2858_s1] sm:$0xff] }
   0x7   :  { %272 = vmatpush.bf16.msra.mxu3 %v2368_v5 }
   0x9   :  { %v1895_v1 = vld [vmem:[%s2876_s25] sm:$0xff] }
   0xa   :  { %24 = vsyncpa [#allocation8], 0  ;;  %1750 = vmatmul.msk.bf16.vlgmr.msra.gmra.mxu0 %vm98_vm1, %v1895_v1  ;;  %245 = vmatpush.bf16.msra.mxu2 %v2362_v3  ;;  %v2382_v7 = vld [vmem:[%s2859_s2 + $0x8] sm:$0xff]  ;;  %v2389_v8 = vld [vmem:[%s2859_s2] sm:$0xff]  ;;  %vm129_vm3 = vcmask 261120   ;;  %s2257_s2 = smov 64  }
   0xb   :  { %1774 = vmatmul.msk.bf16.vlgmr.msra.gmra.mxu3 %vm257_vm2, %v1896_v6  ;;  %139 = vmatpush.bf16.msra.mxu1 %v2382_v7  ;;  %v2398_v13 = vld [vmem:[%s2863_s6] ss:$0 sm:$0xff]  ;;  %s2258_s21 = smov 32   ;;  %s1692_s4 = sshll.u32 %s2871_s14, 4  ;;  %s1693_s4 = int_to_ptr.hbm [resolvable:$true] %s1692_s4 }
   0xc   :  { %v2415_v38 = vld [vmem:[%s2860_s3] ss:$0 sm:$0xff]  ;;  %s1679_s18 = sshll.u32 %s2870_s13, 4  ;;  %s2261_s19 = smov [#allocation2]   ;;  %s1680_s18 = int_to_ptr.hbm [resolvable:$true] %s1679_s18 }
   0xd   :  { %246 = vmatmul.bf16.vlgmr.msra.gmra.mxu2 %v2256_v2  ;;  %s2262_s20 = smov [#allocation6]   ;;  %s1705_s24 = sshll.u32 %s2872_s15, 4  ;;  %s1706_s24 = int_to_ptr.hbm [resolvable:$true] %s1705_s24 }
   0xe   :  { %620 = vmatpush.bf16.msrb.mxu2 %v2354_v0  ;;  %s1703_s22 = sshll.u32 %s2262_s20, 4  ;;  %s2264_s14 = smov 8   ;;  %s1704_s22 = int_to_ptr.vmem [resolvable:$true] %s1703_s22 }
   0xf   :  { %140 = vmatpush.bf16.msra.mxu1 %v2389_v8  ;;  %s2265_s26 = smov [#allocation7]   ;;  %s1718_s29 = sshll.u32 %s2873_s16, 4  ;;  %s1719_s29 = int_to_ptr.hbm [resolvable:$true] %s1718_s29 }
  0x10   :  { %s1716_s27 = sshll.u32 %s2265_s26, 4  ;;  %s1717_s27 = int_to_ptr.vmem [resolvable:$true] %s1716_s27 }
  0x12   :  { %621 = vmatpush.bf16.msrb.mxu2 %v2362_v3 }
  0x13   :  { %522 = vmatpush.bf16.msrb.mxu1 %v2382_v7 }
  0x16   :  { %876 = vmatpush.bf16.msra.mxu2 %v2382_v7 }
  0x17   :  { %523 = vmatpush.bf16.msrb.mxu1 %v2389_v8 }
  0x1a   :  { %877 = vmatpush.bf16.msra.mxu2 %v2389_v8 }
  0x87   :  { %v111_v9 = vpop.f32.mrf.mxu0 }
  0x8e   :  { %v274_v12 = vpop.f32.mrf.mxu3 }
  0x8f   :  { %v113_v10 = vpop.f32.mrf.mxu0 }
  0x90   :  { %v116_v11 = vpack.c.bf16 %v113_v10, %v111_v9  ;;  %v247_v14 = vpop.f32.mrf.mxu2 }
  0x91   :  { %v275_v15 = vadd.f32 %v274_v12, %v247_v14 }
  0x92   :  { %1759 = vmatmul.msk.bf16.vlgmr.msra.gmra.mxu1 %vm129_vm3, %v116_v11 }
  0x93   :  { %v279_v16 = vadd.f32 %v2398_v13, %v275_v15 }
  0x95   :  { %1947 = vtanh.f32 %v279_v16  ;;  %v1775_v23 = vmul.f32 -1.442695, %v279_v16 }
  0x96   :  { %v276_v17 = vpop.f32.mrf.mxu3 }
  0x98   :  { %v249_v18 = vpop.f32.mrf.mxu2 }
  0x99   :  { %v277_v19 = vadd.f32 %v276_v17, %v249_v18 }
  0x9b   :  { %v1948_v20 = vpop.eup %1947  ;;  %v2403_v21 = vadd.f32 %v2398_v13, %v277_v19 }
  0x9c   :  { %325 = vrot.lane.b32.xlu2 %v1948_v20, %s2257_s2 }
  0x9d   :  { %1949 = vtanh.f32 %v2403_v21 }
  0x9e   :  { %1951 = vpow2.f32 %v1775_v23  ;;  %v1776_v23 = vmul.f32 -1.442695, %v2403_v21 }
  0xa3   :  { %v1950_v22 = vpop.eup %1949 }
  0xa4   :  { %327 = vrot.lane.b32.xlu2 %v1950_v22, %s2257_s2  ;;  %v1952_v24 = vpop.eup %1951 }
  0xa5   :  { %v287_v25 = vadd.f32 1.0, %v1952_v24 }
  0xa7   :  { %1953 = vrcp.f32 %v287_v25  ;;  %vm294_vm4 = vweird.f32 %v287_v25  ;;  %v300_v30 = vand.u32 2147483648, %v287_v25  ;;  %v298_v32 = vand.u32 2147483647, %v287_v25 }
  0xa9   :  { %v301_v33 = vor.u32 1.1754944e-38, %v300_v30  ;;  %vm299_vm7 = vcmp.eq.f32.partialorder %v298_v32, 8.507059e+37 }
  0xad   :  { %v1954_v26 = vpop.eup %1953 }
  0xae   :  { %v290_v27 = vmul.f32 %v1954_v26, %v287_v25  ;;  %vm295_vm5 = vweird.f32 %v1954_v26 }
  0xaf   :  { %vm296_vm6 = vmor %vm294_vm4, %vm295_vm5 }
  0xb0   :  { %v291_v28 = vsub.f32 1.0, %v290_v27 }
  0xb2   :  { %v292_v29 = vmul.f32 %v1954_v26, %v291_v28 }
  0xb4   :  { %v293_v31 = vadd.f32 %v1954_v26, %v292_v29 }
  0xb6   :  { %v297_v34 = vsel %vm296_vm6, %v1954_v26, %v293_v31 }
  0xb7   :  { %v2408_v35 = vsel %vm299_vm7, %v301_v33, %v297_v34  ;;  %vm390_vm7 = vcmask 523264  }
  0xb8   :  { %v321_v46 = vmul.f32 0.0, %v2408_v35 }
  0xf6   :  { %v326_v36 = vpop.permute.xlu2 %325 }
  0xf7   :  { %v331_v37 = vmul.f32 %v326_v36, %v2408_v35 }
  0xf9   :  { %335 = vrot.lane.b32.xlu2 %v331_v37, %s2258_s21 }
  0xfe   :  { %v2421_v45 = vpop.permute.xlu2 %327 }
 0x10f   :  { %v142_v39 = vpop.f32.mrf.mxu1 }
 0x110   :  { %v143_v40 = vadd.f32 %v2415_v38, %v142_v39 }
 0x112   :  { %1955 = vtanh.f32 %v143_v40  ;;  %v1760_v50 = vmul.f32 -1.442695, %v143_v40 }
 0x117   :  { %v144_v41 = vpop.f32.mrf.mxu1 }
 0x118   :  { %v1956_v42 = vpop.eup %1955  ;;  %v145_v43 = vadd.f32 %v2415_v38, %v144_v41 }
 0x119   :  { %191 = vrot.lane.b32.xlu0 %v1956_v42, %s2257_s2 }
 0x11a   :  { %1957 = vtanh.f32 %v145_v43  ;;  %v1761_v51 = vmul.f32 -1.442695, %v145_v43 }
 0x120   :  { %v1958_v44 = vpop.eup %1957 }
 0x121   :  { %193 = vrot.lane.b32.xlu0 %v1958_v44, %s2257_s2 }
 0x153   :  { %v336_v47 = vpop.permute.xlu2 %335 }
 0x154   :  { %v2424_v48 = vadd.f32 %v336_v47, %v321_v46 }
 0x156   :  { %1959 = vtanh.f32 %v2424_v48 }
 0x157   :  { %1961 = vpow2.f32 %v1760_v50 }
 0x158   :  { %1963 = vpow2.f32 %v1761_v51 }
 0x15c   :  { %v1960_v49 = vpop.eup %1959 }
 0x15d   :  { %347 = vrot.lane.b32.xlu2 %v1960_v49, %s2257_s2  ;;  %v1962_v52 = vpop.eup %1961 }
 0x15e   :  { %v153_v53 = vadd.f32 1.0, %v1962_v52  ;;  %v1964_v54 = vpop.eup %1963 }
 0x15f   :  { %v154_v55 = vadd.f32 1.0, %v1964_v54 }
 0x160   :  { %1965 = vrcp.f32 %v153_v53  ;;  %v166_v1 = vand.u32 2147483648, %v153_v53  ;;  %vm160_vm9 = vweird.f32 %v153_v53  ;;  %v164_v2 = vand.u32 2147483647, %v153_v53 }
 0x161   :  { %1967 = vrcp.f32 %v154_v55  ;;  %v181_v15 = vand.u32 2147483648, %v154_v55  ;;  %vm175_vm13 = vweird.f32 %v154_v55  ;;  %v179_v16 = vand.u32 2147483647, %v154_v55 }
 0x162   :  { %v167_v9 = vor.u32 1.1754944e-38, %v166_v1  ;;  %vm165_vm11 = vcmp.eq.f32.partialorder %v164_v2, 8.507059e+37  ;;  %1969 = vpow2.f32 %v1776_v23 }
 0x163   :  { %v182_v18 = vor.u32 1.1754944e-38, %v181_v15  ;;  %vm180_vm15 = vcmp.eq.f32.partialorder %v179_v16, 8.507059e+37 }
 0x166   :  { %v1966_v56 = vpop.eup %1965 }
 0x167   :  { %v156_v57 = vmul.f32 %v1966_v56, %v153_v53  ;;  %v1968_v59 = vpop.eup %1967  ;;  %vm161_vm8 = vweird.f32 %v1966_v56 }
 0x168   :  { %v171_v61 = vmul.f32 %v1968_v59, %v154_v55  ;;  %vm162_vm10 = vmor %vm160_vm9, %vm161_vm8  ;;  %vm176_vm12 = vweird.f32 %v1968_v59  ;;  %v1970_v24 = vpop.eup %1969 }
 0x169   :  { %v157_v58 = vsub.f32 1.0, %v156_v57  ;;  %vm177_vm14 = vmor %vm175_vm13, %vm176_vm12  ;;  %v288_v25 = vadd.f32 1.0, %v1970_v24 }
 0x16a   :  { %v172_v63 = vsub.f32 1.0, %v171_v61  ;;  %v1897_v61 = vld [vmem:[%s2876_s25 + $0x8] sm:$0xff] }
 0x16b   :  { %v158_v60 = vmul.f32 %v1966_v56, %v157_v58  ;;  %1971 = vrcp.f32 %v288_v25  ;;  %vm309_vm0 = vweird.f32 %v288_v25  ;;  %v315_v33 = vand.u32 2147483648, %v288_v25  ;;  %v2451_v58 = vld [vmem:[%s2864_s7 + $0x18] sm:$0xff] }
 0x16c   :  { %v173_v6 = vmul.f32 %v1968_v59, %v172_v63  ;;  %v313_v36 = vand.u32 2147483647, %v288_v25  ;;  %398 = vmatpush.bf16.msrb.mxu0 %v2451_v58 }
 0x16d   :  { %v159_v62 = vadd.f32 %v1966_v56, %v158_v60  ;;  %v316_v40 = vor.u32 1.1754944e-38, %v315_v33 }
 0x16e   :  { %v174_v14 = vadd.f32 %v1968_v59, %v173_v6  ;;  %vm314_vm6 = vcmp.eq.f32.partialorder %v313_v36, 8.507059e+37 }
 0x16f   :  { %v163_v4 = vsel %vm162_vm10, %v1966_v56, %v159_v62 }
 0x170   :  { %v168_v11 = vsel %vm165_vm11, %v167_v9, %v163_v4  ;;  %v178_v17 = vsel %vm177_vm14, %v1968_v59, %v174_v14  ;;  %v2457_v59 = vld [vmem:[%s2864_s7 + $0x10] sm:$0xff]  ;;  %v2479_v4 = vld [vmem:[%s2864_s7] sm:$0xff] }
 0x171   :  { %v183_v19 = vsel %vm180_vm15, %v182_v18, %v178_v17  ;;  %v1972_v26 = vpop.eup %1971  ;;  %v187_v29 = vmul.f32 0.0, %v168_v11  ;;  %399 = vmatpush.bf16.msrb.mxu0 %v2457_v59  ;;  %v2502_v18 = vld [vmem:[%s2865_s8] ss:$0 sm:$0xff] }
 0x172   :  { %v305_v27 = vmul.f32 %v1972_v26, %v288_v25  ;;  %vm310_vm4 = vweird.f32 %v1972_v26  ;;  %v188_v21 = vmul.f32 0.0, %v183_v19 }
 0x173   :  { %vm311_vm5 = vmor %vm309_vm0, %vm310_vm4 }
 0x174   :  { %v306_v28 = vsub.f32 1.0, %v305_v27 }
 0x176   :  { %v307_v32 = vmul.f32 %v1972_v26, %v306_v28 }
 0x178   :  { %v308_v34 = vadd.f32 %v1972_v26, %v307_v32 }
 0x17a   :  { %v312_v42 = vsel %vm311_vm5, %v1972_v26, %v308_v34 }
 0x17b   :  { %v317_v43 = vsel %vm314_vm6, %v316_v40, %v312_v42 }
 0x17c   :  { %v332_v44 = vmul.f32 %v2421_v45, %v317_v43  ;;  %v322_v49 = vmul.f32 0.0, %v317_v43 }
 0x18b   :  { %v192_v10 = vpop.permute.xlu0 %191 }
 0x18c   :  { %v197_v12 = vmul.f32 %v192_v10, %v168_v11 }
 0x18e   :  { %201 = vrot.lane.b32.xlu1 %v197_v12, %s2258_s21  ;;  %v1898_v12 = vld [vmem:[%s2858_s1 + $0x8] sm:$0xff] }
 0x193   :  { %v194_v20 = vpop.permute.xlu0 %193 }
 0x194   :  { %v198_v22 = vmul.f32 %v194_v20, %v183_v19 }
 0x196   :  { %203 = vrot.lane.b32.xlu1 %v198_v22, %s2258_s21 }
 0x1b7   :  { %v348_v56 = vpop.permute.xlu2 %347 }
 0x1b8   :  { %v353_v57 = vmul.f32 %v348_v56, %v2408_v35  ;;  %v2463_v35 = vld [vmem:[%s2864_s7 + $0x8] sm:$0xff] }
 0x1b9   :  { %400 = vmatpush.bf16.msrb.mxu0 %v2463_v35 }
 0x1bd   :  { %401 = vmatpush.bf16.msrb.mxu0 %v2479_v4 }
 0x1c1   :  { %643 = vmatpush.bf16.msra.mxu0 %v2368_v5 }
 0x200   :  { %v202_v30 = vpop.permute.xlu1 %201 }
 0x201   :  { %v2431_v31 = vadd.f32 %v202_v30, %v187_v29 }
 0x203   :  { %1973 = vtanh.f32 %v2431_v31 }
 0x208   :  { %v204_v37 = vpop.permute.xlu1 %203 }
 0x209   :  { %v1974_v39 = vpop.eup %1973  ;;  %v2434_v41 = vadd.f32 %v204_v37, %v188_v21 }
 0x20a   :  { %213 = vrot.lane.b32.xlu0 %v1974_v39, %s2257_s2 }
 0x20b   :  { %1975 = vtanh.f32 %v2434_v41 }
 0x211   :  { %v1976_v46 = vpop.eup %1975 }
 0x212   :  { %215 = vrot.lane.b32.xlu1 %v1976_v46, %s2257_s2  ;;  %337 = vrot.lane.b32.xlu0 %v332_v44, %s2258_s21 }
 0x27c   :  { %v214_v47 = vpop.permute.xlu0 %213 }
 0x27d   :  { %v219_v52 = vmul.f32 %v214_v47, %v168_v11 }
 0x284   :  { %v216_v50 = vpop.permute.xlu1 %215  ;;  %v338_v51 = vpop.permute.xlu0 %337 }
 0x285   :  { %v220_v53 = vmul.f32 %v216_v50, %v183_v19  ;;  %v2441_v54 = vadd.f32 %v338_v51, %v322_v49 }
 0x287   :  { %v485_v55 = vpack.c.bf16 %v220_v53, %v219_v52  ;;  %1977 = vtanh.f32 %v2441_v54 }
 0x289   :  { %492 = vrot.lane.b32.xlu1 %v485_v55, %s2258_s21 }
 0x28d   :  { %v1978_v45 = vpop.eup %1977 }
 0x28e   :  { %349 = vrot.lane.b32.xlu0 %v1978_v45, %s2257_s2 }
 0x291   :  { %357 = vrot.lane.b32.xlu1 %v353_v57, %s2258_s21 }
 0x2fb   :  { %v493_v60 = vpop.permute.xlu1 %492 }
 0x2fc   :  { %505 = vmatpush.bf16.msrb.mxu3 %v493_v60 }
 0x2ff   :  { %1802 = vmatmul.msk.bf16.vlgmr.msrb.gmra.mxu3 %vm98_vm1, %v1897_v61 }
 0x300   :  { %752 = vmatpush.bf16.msra.mxu3 %v2451_v58  ;;  %v350_v62 = vpop.permute.xlu0 %349 }
 0x301   :  { %v354_v63 = vmul.f32 %v350_v62, %v317_v43 }
 0x303   :  { %v607_v1 = vpack.c.bf16 %v354_v63, %v353_v57  ;;  %v358_v2 = vpop.permute.xlu1 %357  ;;  %359 = vrot.lane.b32.xlu2 %v354_v63, %s2258_s21 }
 0x304   :  { %753 = vmatpush.bf16.msra.mxu3 %v2457_v59  ;;  %1659 = vst.msk [vmem:[#allocation6] sm:$0xff] %vm129_vm3, %v358_v2  ;;  %v363_v9 = vsel %vm129_vm3, %v358_v2, 0.0 }
 0x305   :  { %609 = vrot.lane.b32.xlu0 %v607_v1, %s2258_s21 }
 0x308   :  { %754 = vmatpush.bf16.msra.mxu3 %v2463_v35 }
 0x30c   :  { %755 = vmatpush.bf16.msra.mxu3 %v2479_v4 }
 0x310   :  { %997 = vmatpush.bf16.msrb.mxu3 %v2368_v5 }
 0x35d   :  { %v360_v6 = vpop.permute.xlu2 %359 }
 0x35e   :  { %v364_v10 = vsel %vm129_vm3, %v360_v6, 0.0  ;;  %1660 = vst.msk [vmem:[#allocation6 + $0x8] sm:$0xff] %vm129_vm3, %v360_v6 }
 0x35f   :  { %v365_v11 = vpack.c.bf16 %v364_v10, %v363_v9 }
 0x361   :  { %1793 = vmatmul.msk.bf16.vlgmr.msrb.gmra.mxu0 %vm390_vm7, %v365_v11 }
 0x362   :  { %974 = vmatpush.bf16.msrb.mxu0 %v2354_v0 }
 0x366   :  { %975 = vmatpush.bf16.msrb.mxu0 %v2362_v3 }
 0x371   :  { %1813 = vmatmul.msk.bf16.vlgmr.msra.gmra.mxu0 %vm257_vm2, %v1898_v12 }
 0x372   :  { %1230 = vmatpush.bf16.msra.mxu0 %v2382_v7 }
 0x376   :  { %1231 = vmatpush.bf16.msra.mxu0 %v2389_v8 }
 0x377   :  { %v610_v14 = vpop.permute.xlu0 %609 }
 0x378   :  { %1808 = vmatmul.msk.bf16.vlgmr.msrb.gmra.mxu2 %vm129_vm3, %v610_v14 }
 0x382   :  { %v507_v15 = vpop.f32.mrf.mxu3 }
 0x38a   :  { %v509_v16 = vpop.f32.mrf.mxu3 }
 0x38b   :  { %v512_v17 = vpack.c.bf16 %v509_v16, %v507_v15 }
 0x38d   :  { %1803 = vmatmul.msk.bf16.vlgmr.msrb.gmra.mxu1 %vm129_vm3, %v512_v17 }
 0x3de   :  { %v403_v19 = vpop.f32.mrf.mxu0 }
 0x3df   :  { %v404_v20 = vadd.f32 %v2502_v18, %v403_v19 }
 0x3e1   :  { %1979 = vtanh.f32 %v404_v20  ;;  %v1794_v39 = vmul.f32 -1.442695, %v404_v20 }
 0x3e6   :  { %v405_v7 = vpop.f32.mrf.mxu0 }
 0x3e7   :  { %v1980_v22 = vpop.eup %1979  ;;  %v406_v8 = vadd.f32 %v2502_v18, %v405_v7 }
 0x3e8   :  { %452 = vrot.lane.b32.xlu1 %v1980_v22, %s2257_s2 }
 0x3e9   :  { %1981 = vtanh.f32 %v406_v8  ;;  %v1795_v36 = vmul.f32 -1.442695, %v406_v8 }
 0x3ee   :  { %v645_v24 = vpop.f32.mrf.mxu0 }
 0x3ef   :  { %v1982_v23 = vpop.eup %1981 }
 0x3f0   :  { %454 = vrot.lane.b32.xlu2 %v1982_v23, %s2257_s2 }
 0x3f6   :  { %v647_v28 = vpop.f32.mrf.mxu0 }
 0x3fb   :  { %v623_v25 = vpop.f32.mrf.mxu2 }
 0x3fc   :  { %v646_v26 = vadd.f32 %v645_v24, %v623_v25 }
 0x3fe   :  { %v650_v27 = vadd.f32 %v2398_v13, %v646_v26 }
 0x400   :  { %1983 = vtanh.f32 %v650_v27  ;;  %v1814_v1 = vmul.f32 -1.442695, %v650_v27 }
 0x403   :  { %v625_v29 = vpop.f32.mrf.mxu2 }
 0x404   :  { %v648_v30 = vadd.f32 %v647_v28, %v625_v29 }
 0x406   :  { %v1984_v32 = vpop.eup %1983  ;;  %v651_v33 = vadd.f32 %v2398_v13, %v648_v30 }
 0x407   :  { %696 = vrot.lane.b32.xlu0 %v1984_v32, %s2257_s2 }
 0x408   :  { %1985 = vtanh.f32 %v651_v33  ;;  %v1815_v10 = vmul.f32 -1.442695, %v651_v33 }
 0x409   :  { %1987 = vpow2.f32 %v1795_v36 }
 0x40a   :  { %v525_v53 = vpop.f32.mrf.mxu1 }
 0x40b   :  { %v2513_v57 = vadd.f32 %v2415_v38, %v525_v53 }
 0x40e   :  { %v1986_v34 = vpop.eup %1985 }
 0x40f   :  { %698 = vrot.lane.b32.xlu1 %v1986_v34, %s2257_s2  ;;  %v1988_v21 = vpop.eup %1987 }
 0x410   :  { %v415_v37 = vadd.f32 1.0, %v1988_v21 }
 0x412   :  { %1989 = vrcp.f32 %v415_v37  ;;  %v442_v51 = vand.u32 2147483648, %v415_v37  ;;  %vm436_vm9 = vweird.f32 %v415_v37  ;;  %v440_v52 = vand.u32 2147483647, %v415_v37  ;;  %v527_v34 = vpop.f32.mrf.mxu1 }
 0x413   :  { %1991 = vpow2.f32 %v1794_v39  ;;  %v528_v39 = vadd.f32 %v2415_v38, %v527_v34 }
 0x414   :  { %v443_v45 = vor.u32 1.1754944e-38, %v442_v51  ;;  %vm441_vm11 = vcmp.eq.f32.partialorder %v440_v52, 8.507059e+37 }
 0x418   :  { %v1990_v40 = vpop.eup %1989 }
 0x419   :  { %v1992_v42 = vpop.eup %1991  ;;  %v432_v43 = vmul.f32 %v1990_v40, %v415_v37  ;;  %vm437_vm8 = vweird.f32 %v1990_v40 }
 0x41a   :  { %v414_v44 = vadd.f32 1.0, %v1992_v42  ;;  %vm438_vm10 = vmor %vm436_vm9, %vm437_vm8 }
 0x41b   :  { %v433_v46 = vsub.f32 1.0, %v432_v43 }
 0x41c   :  { %1993 = vrcp.f32 %v414_v44  ;;  %v427_v11 = vand.u32 2147483648, %v414_v44  ;;  %vm421_vm13 = vweird.f32 %v414_v44  ;;  %v425_v12 = vand.u32 2147483647, %v414_v44 }
 0x41d   :  { %v434_v47 = vmul.f32 %v1990_v40, %v433_v46  ;;  %1995 = vtanh.f32 %v2513_v57 }
 0x41e   :  { %1997 = vpow2.f32 %v1814_v1  ;;  %v428_v16 = vor.u32 1.1754944e-38, %v427_v11  ;;  %vm426_vm15 = vcmp.eq.f32.partialorder %v425_v12, 8.507059e+37 }
 0x41f   :  { %v435_v49 = vadd.f32 %v1990_v40, %v434_v47  ;;  %1999 = vpow2.f32 %v1815_v10 }
 0x421   :  { %v439_v55 = vsel %vm438_vm10, %v1990_v40, %v435_v49 }
 0x422   :  { %v1994_v50 = vpop.eup %1993  ;;  %v2515_v61 = vsel %vm441_vm11, %v443_v45, %v439_v55  ;;  %v1804_v55 = vmul.f32 -1.442695, %v2513_v57 }
 0x423   :  { %v417_v56 = vmul.f32 %v1994_v50, %v414_v44  ;;  %v1996_v6 = vpop.eup %1995  ;;  %vm422_vm12 = vweird.f32 %v1994_v50 }
 0x424   :  { %v1998_v14 = vpop.eup %1997  ;;  %vm423_vm14 = vmor %vm421_vm13, %vm422_vm12 }
 0x425   :  { %v418_v63 = vsub.f32 1.0, %v417_v56  ;;  %v658_v17 = vadd.f32 1.0, %v1998_v14  ;;  %v2000_v22 = vpop.eup %1999 }
 0x426   :  { %v659_v8 = vadd.f32 1.0, %v2000_v22 }
 0x427   :  { %v419_v2 = vmul.f32 %v1994_v50, %v418_v63  ;;  %2001 = vrcp.f32 %v658_v17  ;;  %v671_v32 = vand.u32 2147483648, %v658_v17  ;;  %vm665_vm4 = vweird.f32 %v658_v17 }
 0x428   :  { %2003 = vrcp.f32 %v659_v8  ;;  %v669_v33 = vand.u32 2147483647, %v658_v17  ;;  %v686_v46 = vand.u32 2147483648, %v659_v8  ;;  %vm680_vm9 = vweird.f32 %v659_v8 }
 0x429   :  { %v420_v9 = vadd.f32 %v1994_v50, %v419_v2  ;;  %v672_v37 = vor.u32 1.1754944e-38, %v671_v32  ;;  %2005 = vtanh.f32 %v528_v39  ;;  %v684_v47 = vand.u32 2147483647, %v659_v8 }
 0x42a   :  { %vm670_vm6 = vcmp.eq.f32.partialorder %v669_v33, 8.507059e+37  ;;  %2007 = vpow2.f32 %v1804_v55 }
 0x42b   :  { %v424_v15 = vsel %vm423_vm14, %v1994_v50, %v420_v9  ;;  %v687_v50 = vor.u32 1.1754944e-38, %v686_v46  ;;  %vm685_vm11 = vcmp.eq.f32.partialorder %v684_v47, 8.507059e+37 }
 0x42c   :  { %v2521_v20 = vsel %vm426_vm15, %v428_v16, %v424_v15 }
 0x42d   :  { %v2002_v23 = vpop.eup %2001 }
 0x42e   :  { %v661_v24 = vmul.f32 %v2002_v23, %v658_v17  ;;  %v2004_v26 = vpop.eup %2003  ;;  %vm666_vm0 = vweird.f32 %v2002_v23 }
 0x42f   :  { %v676_v28 = vmul.f32 %v2004_v26, %v659_v8  ;;  %vm667_vm5 = vmor %vm665_vm4, %vm666_vm0  ;;  %vm681_vm8 = vweird.f32 %v2004_v26  ;;  %v2006_v51 = vpop.eup %2005 }
 0x430   :  { %v662_v25 = vsub.f32 1.0, %v661_v24  ;;  %vm682_vm10 = vmor %vm680_vm9, %vm681_vm8  ;;  %v2008_v56 = vpop.eup %2007 }
 0x431   :  { %v677_v30 = vsub.f32 1.0, %v676_v28  ;;  %v536_v45 = vadd.f32 1.0, %v2008_v56 }
 0x432   :  { %v663_v27 = vmul.f32 %v2002_v23, %v662_v25 }
 0x433   :  { %v678_v21 = vmul.f32 %v2004_v26, %v677_v30  ;;  %2009 = vrcp.f32 %v536_v45  ;;  %vm543_vm12 = vweird.f32 %v536_v45  ;;  %v549_v14 = vand.u32 2147483648, %v536_v45 }
 0x434   :  { %v664_v29 = vadd.f32 %v2002_v23, %v663_v27  ;;  %v547_v16 = vand.u32 2147483647, %v536_v45 }
 0x435   :  { %v679_v44 = vadd.f32 %v2004_v26, %v678_v21 }
 0x436   :  { %v668_v36 = vsel %vm667_vm5, %v2002_v23, %v664_v29  ;;  %vm548_vm15 = vcmp.eq.f32.partialorder %v547_v16, 8.507059e+37  ;;  %v1805_v23 = vmul.f32 -1.442695, %v528_v39 }
 0x437   :  { %v2526_v42 = vsel %vm670_vm6, %v672_v37, %v668_v36  ;;  %v683_v49 = vsel %vm682_vm10, %v2004_v26, %v679_v44 }
 0x438   :  { %v2530_v38 = vsel %vm685_vm11, %v687_v50, %v683_v49  ;;  %v692_v34 = vmul.f32 %v2526_v42, %v2424_v48 }
 0x439   :  { %v2010_v63 = vpop.eup %2009  ;;  %v693_v27 = vmul.f32 %v2530_v38, %v2441_v54 }
 0x43a   :  { %v539_v2 = vmul.f32 %v2010_v63, %v536_v45  ;;  %vm544_vm13 = vweird.f32 %v2010_v63 }
 0x43b   :  { %vm545_vm14 = vmor %vm543_vm12, %vm544_vm13 }
 0x43c   :  { %v540_v10 = vsub.f32 1.0, %v539_v2 }
 0x43e   :  { %v541_v57 = vmul.f32 %v2010_v63, %v540_v10 }
 0x440   :  { %v542_v15 = vadd.f32 %v2010_v63, %v541_v57 }
 0x44a   :  { %v455_v60 = vpop.permute.xlu2 %454 }
 0x44b   :  { %v459_v62 = vmul.f32 %v455_v60, %v2515_v61  ;;  %v448_v60 = vmul.f32 0.0, %v2521_v20 }
 0x44d   :  { %464 = vrot.lane.b32.xlu0 %v459_v62, %s2258_s21 }
 0x455   :  { %574 = vrot.lane.b32.xlu0 %v1996_v6, %s2257_s2  ;;  %v449_v6 = vmul.f32 0.0, %v2515_v61 }
 0x45a   :  { %v453_v19 = vpop.permute.xlu1 %452 }
 0x45b   :  { %v458_v7 = vmul.f32 %v453_v19, %v2521_v20  ;;  %v550_v19 = vor.u32 1.1754944e-38, %v549_v14 }
 0x45d   :  { %462 = vrot.lane.b32.xlu2 %v458_v7, %s2258_s21  ;;  %v546_v7 = vsel %vm545_vm14, %v2010_v63, %v542_v15 }
 0x45e   :  { %v2546_v8 = vsel %vm548_vm15, %v550_v19, %v546_v7 }
 0x45f   :  { %v570_v2 = vmul.f32 %v2546_v8, %v2431_v31 }
 0x479   :  { %v697_v40 = vpop.permute.xlu0 %696 }
 0x47a   :  { %v702_v43 = vmul.f32 %v697_v40, %v2526_v42 }
 0x47c   :  { %706 = vrot.lane.b32.xlu1 %v702_v43, %s2258_s21 }
 0x481   :  { %v699_v52 = vpop.permute.xlu1 %698 }
 0x482   :  { %v703_v53 = vmul.f32 %v699_v52, %v2530_v38 }
 0x484   :  { %576 = vrot.lane.b32.xlu1 %v2006_v51, %s2257_s2  ;;  %708 = vrot.lane.b32.xlu2 %v703_v53, %s2258_s21 }
 0x4b7   :  { %v463_v62 = vpop.permute.xlu2 %462 }
 0x4b8   :  { %v2537_v1 = vadd.f32 %v463_v62, %v448_v60 }
 0x4ba   :  { %2011 = vtanh.f32 %v2537_v1 }
 0x4bf   :  { %v465_v9 = vpop.permute.xlu0 %464 }
 0x4c0   :  { %v2012_v11 = vpop.eup %2011  ;;  %v2541_v12 = vadd.f32 %v465_v9, %v449_v6 }
 0x4c1   :  { %474 = vrot.lane.b32.xlu2 %v2012_v11, %s2257_s2 }
 0x4c2   :  { %2013 = vtanh.f32 %v2541_v12 }
 0x4c3   :  { %2015 = vpow2.f32 %v1805_v23 }
 0x4c7   :  { %v575_v22 = vpop.permute.xlu0 %574 }
 0x4c8   :  { %v2014_v17 = vpop.eup %2013  ;;  %v580_v24 = vmul.f32 %v575_v22, %v2546_v8 }
 0x4c9   :  { %476 = vrot.lane.b32.xlu0 %v2014_v17, %s2257_s2  ;;  %v2016_v25 = vpop.eup %2015 }
 0x4ca   :  { %v537_v26 = vadd.f32 1.0, %v2016_v25  ;;  %v1900_v25 = vld [vmem:[%s2858_s1 + $0x10] sm:$0xff] }
 0x4cc   :  { %2017 = vrcp.f32 %v537_v26  ;;  %vm558_vm0 = vweird.f32 %v537_v26  ;;  %v564_v40 = vand.u32 2147483648, %v537_v26  ;;  %v562_v44 = vand.u32 2147483647, %v537_v26 }
 0x4ce   :  { %v565_v47 = vor.u32 1.1754944e-38, %v564_v40  ;;  %vm563_vm6 = vcmp.eq.f32.partialorder %v562_v44, 8.507059e+37 }
 0x4d1   :  { %584 = vrot.lane.b32.xlu0 %v580_v24, %s2258_s21 }
 0x4d2   :  { %v2018_v30 = vpop.eup %2017 }
 0x4d3   :  { %v554_v33 = vmul.f32 %v2018_v30, %v537_v26  ;;  %vm559_vm4 = vweird.f32 %v2018_v30 }
 0x4d4   :  { %vm560_vm5 = vmor %vm558_vm0, %vm559_vm4 }
 0x4d5   :  { %v555_v21 = vsub.f32 1.0, %v554_v33 }
 0x4d7   :  { %v556_v39 = vmul.f32 %v2018_v30, %v555_v21 }
 0x4d9   :  { %v557_v43 = vadd.f32 %v2018_v30, %v556_v39 }
 0x4db   :  { %v561_v49 = vsel %vm560_vm5, %v2018_v30, %v557_v43 }
 0x4dc   :  { %v566_v51 = vsel %vm563_vm6, %v565_v47, %v561_v49  ;;  %v1899_v47 = vld [vmem:[%s2876_s25 + $0x10] sm:$0xff] }
 0x4de   :  { %v709_v28 = vpop.permute.xlu2 %708 }
 0x4df   :  { %v2552_v29 = vadd.f32 %v709_v28, %v693_v27 }
 0x4e1   :  { %2019 = vtanh.f32 %v2552_v29 }
 0x4e7   :  { %v2020_v32 = vpop.eup %2019 }
 0x4e8   :  { %720 = vrot.lane.b32.xlu2 %v2020_v32, %s2257_s2 }
 0x4ee   :  { %v707_v36 = vpop.permute.xlu1 %706 }
 0x4ef   :  { %v2558_v37 = vadd.f32 %v707_v36, %v692_v34 }
 0x4f1   :  { %2021 = vtanh.f32 %v2558_v37 }
 0x4f6   :  { %v577_v50 = vpop.permute.xlu1 %576 }
 0x4f7   :  { %v2022_v46 = vpop.eup %2021  ;;  %v581_v52 = vmul.f32 %v577_v50, %v566_v51 }
 0x4f8   :  { %718 = vrot.lane.b32.xlu1 %v2022_v46, %s2257_s2 }
 0x500   :  { %586 = vrot.lane.b32.xlu1 %v581_v52, %s2258_s21 }
 0x51b   :  { %v475_v53 = vpop.permute.xlu2 %474 }
 0x51c   :  { %v480_v56 = vmul.f32 %v475_v53, %v2521_v20 }
 0x53b   :  { %v477_v55 = vpop.permute.xlu0 %476 }
 0x53c   :  { %v481_v45 = vmul.f32 %v477_v55, %v2515_v61  ;;  %v571_v61 = vmul.f32 %v566_v51, %v2434_v41 }
 0x53e   :  { %v1918_v60 = vpack.i.bf16 %v481_v45, %v480_v56 }
 0x540   :  { %1919 = vrot.lane.b32.xlu0 %v1918_v60, %s2257_s2 }
 0x542   :  { %v721_v62 = vpop.permute.xlu2 %720 }
 0x543   :  { %v585_v63 = vpop.permute.xlu0 %584  ;;  %v725_v9 = vmul.f32 %v721_v62, %v2530_v38 }
 0x544   :  { %v2570_v11 = vadd.f32 %v585_v63, %v570_v2 }
 0x546   :  { %2023 = vtanh.f32 %v2570_v11 }
 0x54c   :  { %v2024_v31 = vpop.eup %2023 }
 0x56a   :  { %v719_v6 = vpop.permute.xlu1 %718 }
 0x56b   :  { %v724_v10 = vmul.f32 %v719_v6, %v2526_v42 }
 0x56d   :  { %v1913_v57 = vpack.i.bf16 %v725_v9, %v724_v10  ;;  %v961_v14 = vpack.c.bf16 %v725_v9, %v724_v10 }
 0x56f   :  { %1914 = vrot.lane.b32.xlu2 %v1913_v57, %s2258_s21  ;;  %963 = vrot.lane.b32.xlu1 %v961_v14, %s2258_s21 }
 0x572   :  { %v587_v20 = vpop.permute.xlu1 %586 }
 0x573   :  { %v2576_v15 = vadd.f32 %v587_v20, %v571_v61 }
 0x575   :  { %2025 = vtanh.f32 %v2576_v15 }
 0x577   :  { %596 = vrot.lane.b32.xlu2 %v2024_v31, %s2257_s2 }
 0x57b   :  { %v2026_v42 = vpop.eup %2025 }
 0x57c   :  { %598 = vrot.lane.b32.xlu0 %v2026_v42, %s2257_s2 }
 0x5b2   :  { %v1920_v38 = vpop.permute.xlu0 %1919 }
 0x5b3   :  { %v1922_v17 = vunpack.i.h.bf16 %v1920_v38  ;;  %v1921_v19 = vunpack.i.l.bf16 %v1920_v38 }
 0x5c9   :  { %v1915_v16 = vpop.permute.xlu2 %1914 }
 0x5ca   :  { %v1917_v7 = vunpack.i.h.bf16 %v1915_v16  ;;  %v1916_v22 = vunpack.i.l.bf16 %v1915_v16 }
 0x5cc   :  { %v743_v23 = vsel %vm129_vm3, %v1917_v7, %v1922_v17  ;;  %v742_v41 = vsel %vm129_vm3, %v1916_v22, %v1921_v19 }
 0x5cd   :  { %v744_v24 = vpack.c.bf16 %v743_v23, %v742_v41 }
 0x5cf   :  { %1816 = vmatmul.msk.bf16.vlgmr.msra.gmra.mxu3 %vm390_vm7, %v744_v24 }
 0x5d0   :  { %1328 = vmatpush.bf16.msra.mxu3 %v2354_v0 }
 0x5d1   :  { %v597_v27 = vpop.permute.xlu2 %596 }
 0x5d2   :  { %v602_v30 = vmul.f32 %v597_v27, %v2546_v8 }
 0x5d4   :  { %1329 = vmatpush.bf16.msra.mxu3 %v2362_v3 }
 0x5df   :  { %1836 = vmatmul.msk.bf16.vlgmr.msrb.gmra.mxu3 %vm257_vm2, %v1900_v25 }
 0x5e1   :  { %v964_v26 = vpop.permute.xlu1 %963 }
 0x5e2   :  { %1831 = vmatmul.msk.bf16.vlgmr.msrb.gmra.mxu0 %vm129_vm3, %v964_v26 }
 0x5ee   :  { %v599_v28 = vpop.permute.xlu0 %598 }
 0x5ef   :  { %v603_v32 = vmul.f32 %v599_v28, %v566_v51 }
 0x5f1   :  { %v839_v33 = vpack.c.bf16 %v603_v32, %v602_v30 }
 0x5f3   :  { %846 = vrot.lane.b32.xlu1 %v839_v33, %s2258_s21 }
 0x652   :  { %v757_v0 = vpop.f32.mrf.mxu3 }
 0x653   :  { %v758_v3 = vadd.f32 %v2502_v18, %v757_v0 }
 0x655   :  { %2027 = vtanh.f32 %v758_v3  ;;  %v1817_v55 = vmul.f32 -1.442695, %v758_v3 }
 0x65a   :  { %v759_v34 = vpop.f32.mrf.mxu3 }
 0x65b   :  { %v2028_v36 = vpop.eup %2027  ;;  %v760_v21 = vadd.f32 %v2502_v18, %v759_v34 }
 0x65c   :  { %806 = vrot.lane.b32.xlu2 %v2028_v36, %s2257_s2 }
 0x65d   :  { %2029 = vtanh.f32 %v760_v21  ;;  %v1818_v63 = vmul.f32 -1.442695, %v760_v21 }
 0x65f   :  { %v977_v39 = vpop.f32.mrf.mxu0 }
 0x662   :  { %v999_v40 = vpop.f32.mrf.mxu3 }
 0x663   :  { %v2030_v43 = vpop.eup %2029  ;;  %v1000_v44 = vadd.f32 %v999_v40, %v977_v39 }
 0x664   :  { %808 = vrot.lane.b32.xlu0 %v2030_v43, %s2257_s2 }
 0x665   :  { %v1004_v8 = vadd.f32 %v2398_v13, %v1000_v44  ;;  %v847_v46 = vpop.permute.xlu1 %846 }
 0x666   :  { %859 = vmatpush.bf16.msra.mxu1 %v847_v46 }
 0x667   :  { %2031 = vtanh.f32 %v1004_v8  ;;  %v979_v49 = vpop.f32.mrf.mxu0  ;;  %v1837_v57 = vmul.f32 -1.442695, %v1004_v8 }
 0x669   :  { %1825 = vmatmul.msk.bf16.vlgmr.msra.gmra.mxu1 %vm98_vm1, %v1899_v47 }
 0x66a   :  { %1106 = vmatpush.bf16.msrb.mxu1 %v2451_v58  ;;  %v1001_v50 = vpop.f32.mrf.mxu3 }
 0x66b   :  { %v1002_v51 = vadd.f32 %v1001_v50, %v979_v49 }
 0x66d   :  { %v2032_v52 = vpop.eup %2031  ;;  %v1005_v53 = vadd.f32 %v2398_v13, %v1002_v51 }
 0x66e   :  { %1107 = vmatpush.bf16.msrb.mxu1 %v2457_v59  ;;  %1050 = vrot.lane.b32.xlu1 %v2032_v52, %s2257_s2 }
 0x66f   :  { %2033 = vtanh.f32 %v1005_v53  ;;  %v1838_v60 = vmul.f32 -1.442695, %v1005_v53 }
 0x670   :  { %2035 = vpow2.f32 %v1817_v55 }
 0x672   :  { %1108 = vmatpush.bf16.msrb.mxu1 %v2463_v35 }
 0x675   :  { %v2034_v58 = vpop.eup %2033 }
 0x676   :  { %1109 = vmatpush.bf16.msrb.mxu1 %v2479_v4  ;;  %1052 = vrot.lane.b32.xlu2 %v2034_v58, %s2257_s2  ;;  %v2036_v56 = vpop.eup %2035 }
 0x677   :  { %v768_v45 = vadd.f32 1.0, %v2036_v56 }
 0x679   :  { %2037 = vrcp.f32 %v768_v45  ;;  %v781_v6 = vand.u32 2147483648, %v768_v45  ;;  %vm775_vm9 = vweird.f32 %v768_v45  ;;  %v779_v9 = vand.u32 2147483647, %v768_v45 }
 0x67a   :  { %1351 = vmatpush.bf16.msra.mxu1 %v2368_v5  ;;  %2039 = vpow2.f32 %v1838_v60 }
 0x67b   :  { %2041 = vpow2.f32 %v1818_v63  ;;  %v782_v61 = vor.u32 1.1754944e-38, %v781_v6  ;;  %vm780_vm11 = vcmp.eq.f32.partialorder %v779_v9, 8.507059e+37 }
 0x67f   :  { %v2038_v59 = vpop.eup %2037 }
 0x680   :  { %v771_v13 = vmul.f32 %v2038_v59, %v768_v45  ;;  %v2040_v35 = vpop.eup %2039  ;;  %vm776_vm8 = vweird.f32 %v2038_v59 }
 0x681   :  { %v1013_v5 = vadd.f32 1.0, %v2040_v35  ;;  %vm777_vm10 = vmor %vm775_vm9, %vm776_vm8  ;;  %v2042_v10 = vpop.eup %2041 }
 0x682   :  { %v772_v62 = vsub.f32 1.0, %v771_v13  ;;  %v769_v20 = vadd.f32 1.0, %v2042_v10 }
 0x683   :  { %2043 = vrcp.f32 %v1013_v5  ;;  %v1040_v28 = vand.u32 2147483648, %v1013_v5  ;;  %vm1034_vm13 = vweird.f32 %v1013_v5  ;;  %v1038_v30 = vand.u32 2147483647, %v1013_v5 }
 0x684   :  { %v773_v2 = vmul.f32 %v2038_v59, %v772_v62  ;;  %2045 = vpow2.f32 %v1837_v57  ;;  %v796_v39 = vand.u32 2147483648, %v769_v20  ;;  %vm790_vm4 = vweird.f32 %v769_v20 }
 0x685   :  { %2047 = vrcp.f32 %v769_v20  ;;  %v1041_v3 = vor.u32 1.1754944e-38, %v1040_v28  ;;  %vm1039_vm15 = vcmp.eq.f32.partialorder %v1038_v30, 8.507059e+37  ;;  %v794_v43 = vand.u32 2147483647, %v769_v20 }
 0x686   :  { %v774_v4 = vadd.f32 %v2038_v59, %v773_v2  ;;  %v797_v46 = vor.u32 1.1754944e-38, %v796_v39 }
 0x687   :  { %vm795_vm6 = vcmp.eq.f32.partialorder %v794_v43, 8.507059e+37 }
 0x688   :  { %v778_v14 = vsel %vm777_vm10, %v2038_v59, %v774_v4 }
 0x689   :  { %v2610_v42 = vsel %vm780_vm11, %v782_v61, %v778_v14  ;;  %v2044_v16 = vpop.eup %2043 }
 0x68a   :  { %v2046_v17 = vpop.eup %2045  ;;  %v1030_v19 = vmul.f32 %v2044_v16, %v1013_v5  ;;  %vm1035_vm12 = vweird.f32 %v2044_v16  ;;  %v802_v2 = vmul.f32 %v2610_v42, %v2537_v1 }
 0x68b   :  { %v2048_v7 = vpop.eup %2047  ;;  %v1012_v22 = vadd.f32 1.0, %v2046_v17  ;;  %vm1036_vm14 = vmor %vm1034_vm13, %vm1035_vm12 }
 0x68c   :  { %v1031_v23 = vsub.f32 1.0, %v1030_v19  ;;  %v786_v41 = vmul.f32 %v2048_v7, %v769_v20  ;;  %vm791_vm0 = vweird.f32 %v2048_v7 }
 0x68d   :  { %2049 = vrcp.f32 %v1012_v22  ;;  %vm792_vm5 = vmor %vm790_vm4, %vm791_vm0  ;;  %v1025_v53 = vand.u32 2147483648, %v1012_v22  ;;  %vm1019_vm9 = vweird.f32 %v1012_v22  ;;  %v1023_v58 = vand.u32 2147483647, %v1012_v22 }
 0x68e   :  { %v1032_v24 = vmul.f32 %v2044_v16, %v1031_v23  ;;  %v787_v25 = vsub.f32 1.0, %v786_v41 }
 0x68f   :  { %v1026_v56 = vor.u32 1.1754944e-38, %v1025_v53  ;;  %vm1024_vm11 = vcmp.eq.f32.partialorder %v1023_v58, 8.507059e+37 }
 0x690   :  { %v1033_v26 = vadd.f32 %v2044_v16, %v1032_v24  ;;  %v788_v32 = vmul.f32 %v2048_v7, %v787_v25 }
 0x692   :  { %v1037_v33 = vsel %vm1036_vm14, %v2044_v16, %v1033_v26  ;;  %v789_v34 = vadd.f32 %v2048_v7, %v788_v32 }
 0x693   :  { %v2050_v27 = vpop.eup %2049  ;;  %v2614_v21 = vsel %vm1039_vm15, %v1041_v3, %v1037_v33 }
 0x694   :  { %v1015_v0 = vmul.f32 %v2050_v27, %v1012_v22  ;;  %v793_v8 = vsel %vm792_vm5, %v2048_v7, %v789_v34  ;;  %vm1020_vm8 = vweird.f32 %v2050_v27  ;;  %v1047_v57 = vmul.f32 %v2614_v21, %v2552_v29 }
 0x695   :  { %v798_v50 = vsel %vm795_vm6, %v797_v46, %v793_v8  ;;  %vm1021_vm10 = vmor %vm1019_vm9, %vm1020_vm8 }
 0x696   :  { %v1016_v44 = vsub.f32 1.0, %v1015_v0  ;;  %v803_v20 = vmul.f32 %v798_v50, %v2541_v12  ;;  %v2647_v12 = vld [vmem:[%s2860_s3] ss:$0 sm:$0xff] }
 0x698   :  { %v1017_v47 = vmul.f32 %v2050_v27, %v1016_v44 }
 0x69a   :  { %v1018_v52 = vadd.f32 %v2050_v27, %v1017_v47 }
 0x69c   :  { %v1022_v55 = vsel %vm1021_vm10, %v2050_v27, %v1018_v52 }
 0x69d   :  { %v1027_v45 = vsel %vm1024_vm11, %v1026_v56, %v1022_v55 }
 0x69e   :  { %v1046_v6 = vmul.f32 %v1027_v45, %v2558_v37 }
 0x6b6   :  { %v807_v31 = vpop.permute.xlu2 %806 }
 0x6b7   :  { %v812_v38 = vmul.f32 %v807_v31, %v2610_v42 }
 0x6b9   :  { %816 = vrot.lane.b32.xlu0 %v812_v38, %s2258_s21 }
 0x6d0   :  { %v1053_v36 = vpop.permute.xlu2 %1052 }
 0x6d1   :  { %v1057_v40 = vmul.f32 %v1053_v36, %v2614_v21 }
 0x6d3   :  { %1062 = vrot.lane.b32.xlu0 %v1057_v40, %s2258_s21 }
 0x6d6   :  { %v809_v49 = vpop.permute.xlu0 %808 }
 0x6d7   :  { %v813_v51 = vmul.f32 %v809_v49, %v798_v50 }
 0x6d9   :  { %818 = vrot.lane.b32.xlu1 %v813_v51, %s2258_s21 }
 0x6e0   :  { %v1051_v59 = vpop.permute.xlu1 %1050 }
 0x6e1   :  { %v1056_v60 = vmul.f32 %v1051_v59, %v1027_v45 }
 0x6e3   :  { %1060 = vrot.lane.b32.xlu2 %v1056_v60, %s2258_s21 }
 0x6e6   :  { %v861_v13 = vpop.f32.mrf.mxu1 }
 0x6ee   :  { %v863_v62 = vpop.f32.mrf.mxu1 }
 0x6ef   :  { %v866_v63 = vpack.c.bf16 %v863_v62, %v861_v13 }
 0x6f1   :  { %1826 = vmatmul.msk.bf16.vlgmr.msra.gmra.mxu2 %vm129_vm3, %v866_v63 }
 0x72b   :  { %v817_v35 = vpop.permute.xlu0 %816 }
 0x72c   :  { %v2623_v4 = vadd.f32 %v817_v35, %v802_v2 }
 0x72e   :  { %2051 = vtanh.f32 %v2623_v4 }
 0x734   :  { %v2052_v5 = vpop.eup %2051 }
 0x735   :  { %828 = vrot.lane.b32.xlu1 %v2052_v5, %s2257_s2 }
 0x73d   :  { %v1061_v9 = vpop.permute.xlu2 %1060 }
 0x73e   :  { %v2628_v10 = vadd.f32 %v1061_v9, %v1046_v6 }
 0x740   :  { %2053 = vtanh.f32 %v2628_v10 }
 0x745   :  { %v1063_v14 = vpop.permute.xlu0 %1062 }
 0x746   :  { %v2054_v1 = vpop.eup %2053  ;;  %v2633_v61 = vadd.f32 %v1063_v14, %v1047_v57 }
 0x747   :  { %1072 = vrot.lane.b32.xlu0 %v2054_v1, %s2257_s2 }
 0x748   :  { %2055 = vtanh.f32 %v2633_v61 }
 0x74b   :  { %v819_v31 = vpop.permute.xlu1 %818 }
 0x74c   :  { %v2638_v37 = vadd.f32 %v819_v31, %v803_v20 }
 0x74e   :  { %v2056_v38 = vpop.eup %2055  ;;  %2057 = vtanh.f32 %v2638_v37 }
 0x74f   :  { %1074 = vrot.lane.b32.xlu1 %v2056_v38, %s2257_s2 }
 0x754   :  { %v2058_v16 = vpop.eup %2057 }
 0x755   :  { %830 = vrot.lane.b32.xlu2 %v2058_v16, %s2257_s2 }
 0x774   :  { %v879_v29 = vpop.f32.mrf.mxu2 }
 0x775   :  { %v880_v33 = vadd.f32 %v2647_v12, %v879_v29 }
 0x777   :  { %v1827_v3 = vmul.f32 -1.442695, %v880_v33 }
 0x77c   :  { %v881_v19 = vpop.f32.mrf.mxu2 }
 0x77d   :  { %v882_v41 = vadd.f32 %v2647_v12, %v881_v19 }
 0x77f   :  { %2059 = vtanh.f32 %v882_v41  ;;  %v1828_v34 = vmul.f32 -1.442695, %v882_v41 }
 0x780   :  { %2061 = vtanh.f32 %v880_v33 }
 0x781   :  { %2063 = vpow2.f32 %v1827_v3 }
 0x782   :  { %2065 = vpow2.f32 %v1828_v34 }
 0x785   :  { %v2060_v25 = vpop.eup %2059 }
 0x786   :  { %v2062_v0 = vpop.eup %2061 }
 0x787   :  { %v2064_v36 = vpop.eup %2063 }
 0x788   :  { %v890_v39 = vadd.f32 1.0, %v2064_v36  ;;  %v2066_v40 = vpop.eup %2065 }
 0x78a   :  { %2067 = vrcp.f32 %v890_v39  ;;  %vm897_vm12 = vweird.f32 %v890_v39  ;;  %v903_v52 = vand.u32 2147483648, %v890_v39  ;;  %v901_v58 = vand.u32 2147483647, %v890_v39 }
 0x78c   :  { %vm902_vm15 = vcmp.eq.f32.partialorder %v901_v58, 8.507059e+37 }
 0x790   :  { %v2068_v43 = vpop.eup %2067 }
 0x791   :  { %v893_v44 = vmul.f32 %v2068_v43, %v890_v39  ;;  %vm898_vm13 = vweird.f32 %v2068_v43 }
 0x792   :  { %vm2657_vm14 = vmor %vm897_vm12, %vm898_vm13 }
 0x793   :  { %v894_v46 = vsub.f32 1.0, %v893_v44 }
 0x795   :  { %v895_v49 = vmul.f32 %v2068_v43, %v894_v46 }
 0x797   :  { %v896_v53 = vadd.f32 %v2068_v43, %v895_v49 }
 0x799   :  { %v900_v59 = vsel %vm2657_vm14, %v2068_v43, %v896_v53  ;;  %v2148_v43 = vld [vmem:[%s2863_s6] ss:$0 sm:$0xff] }
 0x7a7   :  { %v829_v17 = vpop.permute.xlu1 %828 }
 0x7a8   :  { %v834_v22 = vmul.f32 %v829_v17, %v2610_v42 }
 0x7af   :  { %v831_v7 = vpop.permute.xlu2 %830 }
 0x7b0   :  { %v835_v23 = vmul.f32 %v831_v7, %v798_v50 }
 0x7b2   :  { %v1928_v24 = vpack.i.bf16 %v835_v23, %v834_v22  ;;  %v1902_v22 = vld [vmem:[%s2858_s1 + $0x18] sm:$0xff] }
 0x7b4   :  { %1929 = vrot.lane.b32.xlu0 %v1928_v24, %s2257_s2 }
 0x7b9   :  { %v1073_v26 = vpop.permute.xlu0 %1072 }
 0x7ba   :  { %v1078_v28 = vmul.f32 %v1073_v26, %v1027_v45  ;;  %v904_v45 = vor.u32 1.1754944e-38, %v903_v52 }
 0x7bc   :  { %930 = vrot.lane.b32.xlu0 %v2060_v25, %s2257_s2  ;;  %v2663_v9 = vsel %vm902_vm15, %v904_v45, %v900_v59 }
 0x7bd   :  { %v924_v26 = vmul.f32 %v2663_v9, %v2570_v11 }
 0x7c1   :  { %v1075_v27 = vpop.permute.xlu1 %1074 }
 0x7c2   :  { %v1079_v42 = vmul.f32 %v1075_v27, %v2614_v21  ;;  %v891_v21 = vadd.f32 1.0, %v2066_v40 }
 0x7c4   :  { %v1923_v30 = vpack.i.bf16 %v1079_v42, %v1078_v28  ;;  %v1315_v32 = vpack.c.bf16 %v1079_v42, %v1078_v28  ;;  %2069 = vrcp.f32 %v891_v21  ;;  %vm912_vm0 = vweird.f32 %v891_v21 }
 0x7c5   :  { %v916_v62 = vand.u32 2147483647, %v891_v21  ;;  %v918_v63 = vand.u32 2147483648, %v891_v21 }
 0x7c6   :  { %1924 = vrot.lane.b32.xlu2 %v1923_v30, %s2258_s21  ;;  %1317 = vrot.lane.b32.xlu1 %v1315_v32, %s2258_s21 }
 0x7c7   :  { %v919_v38 = vor.u32 1.1754944e-38, %v918_v63  ;;  %vm917_vm6 = vcmp.eq.f32.partialorder %v916_v62, 8.507059e+37 }
 0x7ca   :  { %v2070_v8 = vpop.eup %2069 }
 0x7cb   :  { %v908_v47 = vmul.f32 %v2070_v8, %v891_v21  ;;  %vm913_vm4 = vweird.f32 %v2070_v8 }
 0x7cc   :  { %vm914_vm5 = vmor %vm912_vm0, %vm913_vm4 }
 0x7cd   :  { %v909_v50 = vsub.f32 1.0, %v908_v47 }
 0x7ce   :  { %928 = vrot.lane.b32.xlu2 %v2062_v0, %s2257_s2 }
 0x7cf   :  { %v910_v56 = vmul.f32 %v2070_v8, %v909_v50 }
 0x7d1   :  { %v911_v13 = vadd.f32 %v2070_v8, %v910_v56 }
 0x7d3   :  { %v915_v16 = vsel %vm914_vm5, %v2070_v8, %v911_v13 }
 0x7d4   :  { %v920_v29 = vsel %vm917_vm6, %v919_v38, %v915_v16 }
 0x7d5   :  { %v925_v23 = vmul.f32 %v920_v29, %v2576_v15 }
 0x820   :  { %v1925_v51 = vpop.permute.xlu2 %1924 }
 0x821   :  { %v1927_v2 = vunpack.i.h.bf16 %v1925_v51  ;;  %v1926_v35 = vunpack.i.l.bf16 %v1925_v51 }
 0x826   :  { %v1930_v60 = vpop.permute.xlu0 %1929 }
 0x827   :  { %v1932_v5 = vunpack.i.h.bf16 %v1930_v60  ;;  %v1931_v6 = vunpack.i.l.bf16 %v1930_v60 }
 0x828   :  { %v929_v57 = vpop.permute.xlu2 %928 }
 0x829   :  { %v1096_v14 = vsel %vm129_vm3, %v1926_v35, %v1931_v6  ;;  %v1097_v1 = vsel %vm129_vm3, %v1927_v2, %v1932_v5  ;;  %v934_v20 = vmul.f32 %v929_v57, %v2663_v9 }
 0x82a   :  { %v1098_v31 = vpack.c.bf16 %v1097_v1, %v1096_v14 }
 0x82b   :  { %938 = vrot.lane.b32.xlu1 %v934_v20, %s2258_s21 }
 0x82c   :  { %1839 = vmatmul.msk.bf16.vlgmr.msrb.gmra.mxu1 %vm390_vm7, %v1098_v31 }
 0x82e   :  { %v931_v17 = vpop.permute.xlu0 %930 }
 0x82f   :  { %v935_v19 = vmul.f32 %v931_v17, %v920_v29 }
 0x831   :  { %940 = vrot.lane.b32.xlu2 %v935_v19, %s2258_s21 }
 0x838   :  { %v1318_v7 = vpop.permute.xlu1 %1317 }
 0x839   :  { %1854 = vmatmul.msk.bf16.vlgmr.msra.gmra.mxu3 %vm129_vm3, %v1318_v7 }
 0x83c   :  { %1859 = vmatmul.msk.bf16.vlgmr.msra.gmra.mxu1 %vm257_vm2, %v1902_v22 }
 0x88b   :  { %v941_v41 = vpop.permute.xlu2 %940 }
 0x88c   :  { %v2677_v24 = vadd.f32 %v941_v41, %v925_v23 }
 0x88e   :  { %2071 = vtanh.f32 %v2677_v24 }
 0x894   :  { %v2072_v25 = vpop.eup %2071 }
 0x895   :  { %952 = vrot.lane.b32.xlu1 %v2072_v25, %s2257_s2 }
 0x89d   :  { %v939_v27 = vpop.permute.xlu1 %938 }
 0x89e   :  { %v2683_v28 = vadd.f32 %v939_v27, %v924_v26 }
 0x8a0   :  { %2073 = vtanh.f32 %v2683_v28 }
 0x8a6   :  { %v2074_v42 = vpop.eup %2073 }
 0x8a7   :  { %950 = vrot.lane.b32.xlu0 %v2074_v42, %s2257_s2 }
 0x8a9   :  { %v1111_v15 = vpop.f32.mrf.mxu1 }
 0x8aa   :  { %v1112_v30 = vadd.f32 %v2502_v18, %v1111_v15 }
 0x8ac   :  { %2075 = vtanh.f32 %v1112_v30 }
 0x8b1   :  { %v1113_v32 = vpop.f32.mrf.mxu1 }
 0x8b2   :  { %v2076_v33 = vpop.eup %2075  ;;  %v1114_v0 = vadd.f32 %v2502_v18, %v1113_v32  ;;  %v1840_v18 = vmul.f32 -1.442695, %v1112_v30 }
 0x8b3   :  { %1160 = vrot.lane.b32.xlu0 %v2076_v33, %s2257_s2 }
 0x8b4   :  { %2077 = vtanh.f32 %v1114_v0  ;;  %v1841_v46 = vmul.f32 -1.442695, %v1114_v0 }
 0x8b9   :  { %v1353_v11 = vpop.f32.mrf.mxu1 }
 0x8ba   :  { %v2078_v3 = vpop.eup %2077 }
 0x8bb   :  { %1162 = vrot.lane.b32.xlu1 %v2078_v3, %s2257_s2 }
 0x8bc   :  { %v1331_v34 = vpop.f32.mrf.mxu3 }
 0x8bd   :  { %v1354_v36 = vadd.f32 %v1353_v11, %v1331_v34 }
 0x8bf   :  { %v1358_v2 = vadd.f32 %v2148_v43, %v1354_v36 }
 0x8c1   :  { %v1355_v39 = vpop.f32.mrf.mxu1 }
 0x8c4   :  { %v1333_v40 = vpop.f32.mrf.mxu3 }
 0x8c5   :  { %v1356_v21 = vadd.f32 %v1355_v39, %v1333_v40 }
 0x8c7   :  { %v1359_v44 = vadd.f32 %v2148_v43, %v1356_v21  ;;  %v1860_v43 = vmul.f32 -1.442695, %v1358_v2 }
 0x8c9   :  { %2079 = vtanh.f32 %v1359_v44  ;;  %v1861_v58 = vmul.f32 -1.442695, %v1359_v44 }
 0x8ca   :  { %2081 = vpow2.f32 %v1840_v18 }
 0x8cb   :  { %2083 = vpow2.f32 %v1841_v46 }
 0x8cf   :  { %v2080_v8 = vpop.eup %2079 }
 0x8d0   :  { %1406 = vrot.lane.b32.xlu0 %v2080_v8, %s2257_s2  ;;  %v2082_v47 = vpop.eup %2081 }
 0x8d1   :  { %v1122_v49 = vadd.f32 1.0, %v2082_v47  ;;  %v2084_v50 = vpop.eup %2083 }
 0x8d2   :  { %v1123_v51 = vadd.f32 1.0, %v2084_v50 }
 0x8d3   :  { %2085 = vrcp.f32 %v1122_v49  ;;  %v1135_v14 = vand.u32 2147483648, %v1122_v49  ;;  %vm1129_vm8 = vweird.f32 %v1122_v49  ;;  %v1133_v1 = vand.u32 2147483647, %v1122_v49 }
 0x8d4   :  { %2087 = vrcp.f32 %v1123_v51  ;;  %v1150_v22 = vand.u32 2147483648, %v1123_v51  ;;  %vm1144_vm12 = vweird.f32 %v1123_v51  ;;  %v1148_v23 = vand.u32 2147483647, %v1123_v51 }
 0x8d5   :  { %2089 = vpow2.f32 %v1861_v58  ;;  %v1136_v16 = vor.u32 1.1754944e-38, %v1135_v14  ;;  %vm1134_vm10 = vcmp.eq.f32.partialorder %v1133_v1, 8.507059e+37  ;;  %v2149_v58 = vld [vmem:[%s2864_s7 + $0x18] sm:$0xff] }
 0x8d6   :  { %2091 = vtanh.f32 %v1358_v2  ;;  %v1151_v25 = vor.u32 1.1754944e-38, %v1150_v22  ;;  %vm1149_vm14 = vcmp.eq.f32.partialorder %v1148_v23, 8.507059e+37  ;;  %v2152_v2 = vld [vmem:[%s2864_s7] sm:$0xff] }
 0x8d9   :  { %v2086_v52 = vpop.eup %2085 }
 0x8da   :  { %v1125_v53 = vmul.f32 %v2086_v52, %v1122_v49  ;;  %v2088_v56 = vpop.eup %2087  ;;  %vm1130_vm2 = vweird.f32 %v2086_v52 }
 0x8db   :  { %v1140_v63 = vmul.f32 %v2088_v56, %v1123_v51  ;;  %v2090_v57 = vpop.eup %2089  ;;  %vm1131_vm9 = vmor %vm1129_vm8, %vm1130_vm2  ;;  %vm1145_vm11 = vweird.f32 %v2088_v56  ;;  %v1901_v51 = vld [vmem:[%s2876_s25 + $0x18] sm:$0xff]  ;;  %s1677_s25 = sshll.u32 %s2261_s19, 4  ;;  %s1678_s25 = int_to_ptr.vmem [resolvable:$true] %s1677_s25 }
 0x8dc   :  { %v1126_v55 = vsub.f32 1.0, %v1125_v53  ;;  %v1367_v20 = vadd.f32 1.0, %v2090_v57  ;;  %vm1146_vm13 = vmor %vm1144_vm12, %vm1145_vm11 }
 0x8dd   :  { %v1141_v6 = vsub.f32 1.0, %v1140_v63  ;;  %v2151_v63 = vld [vmem:[%s2864_s7 + $0x8] sm:$0xff] }
 0x8de   :  { %v1127_v62 = vmul.f32 %v2086_v52, %v1126_v55  ;;  %2093 = vrcp.f32 %v1367_v20  ;;  %v1394_v11 = vand.u32 2147483648, %v1367_v20  ;;  %vm1388_vm0 = vweird.f32 %v1367_v20 }
 0x8df   :  { %v1142_v38 = vmul.f32 %v2088_v56, %v1141_v6  ;;  %v1392_v3 = vand.u32 2147483647, %v1367_v20  ;;  %2095 = vpow2.f32 %v1860_v43 }
 0x8e0   :  { %v1128_v5 = vadd.f32 %v2086_v52, %v1127_v62  ;;  %v1395_v36 = vor.u32 1.1754944e-38, %v1394_v11 }
 0x8e1   :  { %v1143_v7 = vadd.f32 %v2088_v56, %v1142_v38  ;;  %vm1393_vm5 = vcmp.eq.f32.partialorder %v1392_v3, 8.507059e+37 }
 0x8e2   :  { %v1132_v31 = vsel %vm1131_vm9, %v2086_v52, %v1128_v5 }
 0x8e3   :  { %v1147_v41 = vsel %vm1146_vm13, %v2088_v56, %v1143_v7 }
 0x8e4   :  { %v2702_v27 = vsel %vm1149_vm14, %v1151_v25, %v1147_v41 }
 0x907   :  { %v953_v45 = vpop.permute.xlu1 %952 }
 0x908   :  { %v957_v60 = vmul.f32 %v953_v45, %v920_v29  ;;  %v2697_v29 = vsel %vm1134_vm10, %v1136_v16, %v1132_v31 }
 0x909   :  { %v1156_v14 = vmul.f32 %v2697_v29, %v2623_v4 }
 0x919   :  { %v951_v59 = vpop.permute.xlu0 %950 }
 0x91a   :  { %v956_v13 = vmul.f32 %v951_v59, %v2663_v9  ;;  %v2092_v9 = vpop.eup %2091  ;;  %v2150_v59 = vld [vmem:[%s2864_s7 + $0x10] sm:$0xff] }
 0x91b   :  { %v2094_v26 = vpop.eup %2093 }
 0x91c   :  { %v1193_v35 = vpack.c.bf16 %v957_v60, %v956_v13  ;;  %v1384_v30 = vmul.f32 %v2094_v26, %v1367_v20  ;;  %vm1389_vm15 = vweird.f32 %v2094_v26  ;;  %v2096_v44 = vpop.eup %2095 }
 0x91d   :  { %vm1390_vm4 = vmor %vm1388_vm0, %vm1389_vm15  ;;  %v1366_v8 = vadd.f32 1.0, %v2096_v44 }
 0x91e   :  { %1200 = vrot.lane.b32.xlu2 %v1193_v35, %s2258_s21  ;;  %v1385_v32 = vsub.f32 1.0, %v1384_v30  ;;  %v1157_v35 = vmul.f32 %v2702_v27, %v2638_v37 }
 0x91f   :  { %2097 = vrcp.f32 %v1366_v8  ;;  %v1379_v53 = vand.u32 2147483648, %v1366_v8  ;;  %vm1373_vm2 = vweird.f32 %v1366_v8  ;;  %v1377_v55 = vand.u32 2147483647, %v1366_v8 }
 0x920   :  { %v1386_v33 = vmul.f32 %v2094_v26, %v1385_v32 }
 0x921   :  { %v1380_v45 = vor.u32 1.1754944e-38, %v1379_v53  ;;  %vm1378_vm9 = vcmp.eq.f32.partialorder %v1377_v55, 8.507059e+37 }
 0x922   :  { %v1387_v0 = vadd.f32 %v2094_v26, %v1386_v33 }
 0x924   :  { %v1391_v34 = vsel %vm1390_vm4, %v2094_v26, %v1387_v0 }
 0x925   :  { %v1161_v17 = vpop.permute.xlu0 %1160  ;;  %v2706_v39 = vsel %vm1393_vm5, %v1395_v36, %v1391_v34  ;;  %v2098_v18 = vpop.eup %2097 }
 0x926   :  { %v1166_v19 = vmul.f32 %v1161_v17, %v2697_v29  ;;  %1404 = vrot.lane.b32.xlu2 %v2092_v9, %s2257_s2  ;;  %v1369_v46 = vmul.f32 %v2098_v18, %v1366_v8  ;;  %vm1374_vm6 = vweird.f32 %v2098_v18  ;;  %v1401_v37 = vmul.f32 %v2706_v39, %v2633_v61 }
 0x927   :  { %vm1375_vm8 = vmor %vm1373_vm2, %vm1374_vm6 }
 0x928   :  { %1170 = vrot.lane.b32.xlu1 %v1166_v19, %s2258_s21  ;;  %v1370_v47 = vsub.f32 1.0, %v1369_v46 }
 0x92a   :  { %v1371_v49 = vmul.f32 %v2098_v18, %v1370_v47 }
 0x92c   :  { %v1372_v52 = vadd.f32 %v2098_v18, %v1371_v49 }
 0x92d   :  { %v1163_v42 = vpop.permute.xlu1 %1162 }
 0x92e   :  { %v1167_v15 = vmul.f32 %v1163_v42, %v2702_v27  ;;  %v1376_v56 = vsel %vm1375_vm8, %v2098_v18, %v1372_v52 }
 0x92f   :  { %v1381_v60 = vsel %vm1378_vm9, %v1380_v45, %v1376_v56 }
 0x930   :  { %1172 = vrot.lane.b32.xlu2 %v1167_v15, %s2258_s21  ;;  %v1400_v17 = vmul.f32 %v1381_v60, %v2628_v10 }
 0x942   :  { %v1407_v40 = vpop.permute.xlu0 %1406 }
 0x943   :  { %v1411_v21 = vmul.f32 %v1407_v40, %v2706_v39 }
 0x945   :  { %1416 = vrot.lane.b32.xlu1 %v1411_v21, %s2258_s21 }
 0x978   :  { %v1201_v50 = vpop.permute.xlu2 %1200 }
 0x979   :  { %1213 = vmatpush.bf16.msrb.mxu2 %v1201_v50 }
 0x97c   :  { %1848 = vmatmul.msk.bf16.vlgmr.msrb.gmra.mxu2 %vm98_vm1, %v1901_v51 }
 0x97d   :  { %1460 = vmatpush.bf16.msra.mxu2 %v2149_v58 }
 0x980   :  { %v1405_v13 = vpop.permute.xlu2 %1404 }
 0x981   :  { %1461 = vmatpush.bf16.msra.mxu2 %v2150_v59  ;;  %v1410_v62 = vmul.f32 %v1405_v13, %v1381_v60 }
 0x983   :  { %1414 = vrot.lane.b32.xlu0 %v1410_v62, %s2258_s21 }
 0x985   :  { %1462 = vmatpush.bf16.msra.mxu2 %v2151_v63 }
 0x989   :  { %1463 = vmatpush.bf16.msra.mxu2 %v2152_v2 }
 0x98a   :  { %v1173_v5 = vpop.permute.xlu2 %1172 }
 0x98b   :  { %v2729_v6 = vadd.f32 %v1173_v5, %v1157_v35 }
 0x98d   :  { %2099 = vtanh.f32 %v2729_v6 }
 0x993   :  { %v2100_v57 = vpop.eup %2099 }
 0x994   :  { %1184 = vrot.lane.b32.xlu0 %v2100_v57, %s2257_s2 }
 0x99a   :  { %v1171_v1 = vpop.permute.xlu1 %1170 }
 0x99b   :  { %v2735_v20 = vadd.f32 %v1171_v1, %v1156_v14 }
 0x99d   :  { %2101 = vtanh.f32 %v2735_v20 }
 0x9a3   :  { %v2102_v31 = vpop.eup %2101 }
 0x9a4   :  { %1182 = vrot.lane.b32.xlu2 %v2102_v31, %s2257_s2 }
 0x9b7   :  { %v1417_v38 = vpop.permute.xlu1 %1416 }
 0x9b8   :  { %v1421_v16 = vadd.f32 %v1417_v38, %v1401_v37  ;;  %v2153_v37 = vld [vmem:[%s2865_s8] ss:$0 sm:$0xff]  ;;  %s2263_s8 = smov 128  }
 0x9ba   :  { %2103 = vtanh.f32 %v1421_v16 }
 0x9c0   :  { %v2104_v9 = vpop.eup %2103 }
 0x9c1   :  { %1428 = vrot.lane.b32.xlu2 %v2104_v9, %s2257_s2 }
 0x9f5   :  { %v1415_v4 = vpop.permute.xlu0 %1414 }
 0x9f6   :  { %v1420_v19 = vadd.f32 %v1415_v4, %v1400_v17 }
 0x9f8   :  { %2105 = vtanh.f32 %v1420_v19 }
 0x9fe   :  { %v2106_v7 = vpop.eup %2105  ;;  %v1183_v23 = vpop.permute.xlu2 %1182 }
 0x9ff   :  { %v1215_v22 = vpop.f32.mrf.mxu2  ;;  %1426 = vrot.lane.b32.xlu1 %v2106_v7, %s2257_s2  ;;  %v1188_v25 = vmul.f32 %v1183_v23, %v2697_v29 }
 0xa06   :  { %v1185_v41 = vpop.permute.xlu0 %1184 }
 0xa07   :  { %v1189_v61 = vmul.f32 %v1185_v41, %v2702_v27  ;;  %v1217_v26 = vpop.f32.mrf.mxu2 }
 0xa08   :  { %v1220_v42 = vpack.c.bf16 %v1217_v26, %v1215_v22 }
 0xa09   :  { %v1938_v15 = vpack.i.bf16 %v1189_v61, %v1188_v25 }
 0xa0a   :  { %1849 = vmatmul.msk.bf16.vlgmr.msra.gmra.mxu0 %vm129_vm3, %v1220_v42 }
 0xa0b   :  { %1939 = vrot.lane.b32.xlu1 %v1938_v15, %s2257_s2 }
 0xa1b   :  { %v1429_v10 = vpop.permute.xlu2 %1428 }
 0xa1c   :  { %v1433_v32 = vmul.f32 %v1429_v10, %v2706_v39 }
 0xa71   :  { %v1427_v30 = vpop.permute.xlu1 %1426 }
 0xa72   :  { %v1432_v33 = vmul.f32 %v1427_v30, %v1381_v60 }
 0xa74   :  { %v1933_v0 = vpack.i.bf16 %v1433_v32, %v1432_v33 }
 0xa76   :  { %1934 = vrot.lane.b32.xlu0 %v1933_v0, %s2258_s21 }
 0xa7d   :  { %v1940_v49 = vpop.permute.xlu1 %1939 }
 0xa7e   :  { %v1942_v53 = vunpack.i.h.bf16 %v1940_v49  ;;  %v1941_v58 = vunpack.i.l.bf16 %v1940_v49 }
 0xa87   :  { %v1233_v11 = vpop.f32.mrf.mxu0 }
 0xa88   :  { %v1234_v29 = vadd.f32 %v2647_v12, %v1233_v11 }
 0xa8a   :  { %2107 = vtanh.f32 %v1234_v29  ;;  %v1850_v40 = vmul.f32 -1.442695, %v1234_v29 }
 0xa8f   :  { %v1235_v27 = vpop.f32.mrf.mxu0 }
 0xa90   :  { %v2108_v3 = vpop.eup %2107  ;;  %v1236_v34 = vadd.f32 %v2647_v12, %v1235_v27 }
 0xa91   :  { %1282 = vrot.lane.b32.xlu2 %v2108_v3, %s2257_s2 }
 0xa92   :  { %2109 = vtanh.f32 %v1236_v34  ;;  %v1851_v2 = vmul.f32 -1.442695, %v1236_v34 }
 0xa93   :  { %2111 = vpow2.f32 %v1850_v40 }
 0xa98   :  { %v2110_v36 = vpop.eup %2109 }
 0xa99   :  { %1284 = vrot.lane.b32.xlu0 %v2110_v36, %s2257_s2  ;;  %v2112_v39 = vpop.eup %2111 }
 0xa9a   :  { %v1244_v21 = vadd.f32 1.0, %v2112_v39 }
 0xa9c   :  { %2113 = vrcp.f32 %v1244_v21  ;;  %vm1251_vm1 = vweird.f32 %v1244_v21  ;;  %v1257_v46 = vand.u32 2147483648, %v1244_v21  ;;  %v1255_v12 = vand.u32 2147483647, %v1244_v21 }
 0xa9d   :  { %2115 = vpow2.f32 %v1851_v2 }
 0xa9e   :  { %v1258_v50 = vor.u32 1.1754944e-38, %v1257_v46  ;;  %vm1256_vm12 = vcmp.eq.f32.partialorder %v1255_v12, 8.507059e+37 }
 0xaa2   :  { %v2114_v43 = vpop.eup %2113 }
 0xaa3   :  { %v1247_v44 = vmul.f32 %v2114_v43, %v1244_v21  ;;  %vm1252_vm10 = vweird.f32 %v2114_v43  ;;  %v2116_v35 = vpop.eup %2115 }
 0xaa4   :  { %vm1253_vm11 = vmor %vm1251_vm1, %vm1252_vm10  ;;  %v1245_v5 = vadd.f32 1.0, %v2116_v35  ;;  %vm1612_vm10 = vcmask 31744  }
 0xaa5   :  { %v1248_v8 = vsub.f32 1.0, %v1247_v44 }
 0xaa6   :  { %2117 = vrcp.f32 %v1245_v5  ;;  %vm1266_vm13 = vweird.f32 %v1245_v5  ;;  %v1272_v17 = vand.u32 2147483648, %v1245_v5  ;;  %v1270_v19 = vand.u32 2147483647, %v1245_v5 }
 0xaa7   :  { %v1249_v18 = vmul.f32 %v2114_v43, %v1248_v8 }
 0xaa8   :  { %v1273_v41 = vor.u32 1.1754944e-38, %v1272_v17  ;;  %vm1271_vm15 = vcmp.eq.f32.partialorder %v1270_v19, 8.507059e+37 }
 0xaa9   :  { %v1250_v47 = vadd.f32 %v2114_v43, %v1249_v18 }
 0xaab   :  { %v1254_v52 = vsel %vm1253_vm11, %v2114_v43, %v1250_v47 }
 0xaac   :  { %v2756_v60 = vsel %vm1256_vm12, %v1258_v50, %v1254_v52  ;;  %v2118_v57 = vpop.eup %2117 }
 0xaad   :  { %v1262_v14 = vmul.f32 %v2118_v57, %v1245_v5  ;;  %vm1267_vm14 = vweird.f32 %v2118_v57  ;;  %v1278_v26 = vmul.f32 %v2756_v60, %v2683_v28  ;;  %v1892_v5 = vld [vmem:[%s2866_s9 + $0x8] sm:$0xff] }
 0xaae   :  { %1602 = vmatpush.bf16.msrb.mxu3 %v1892_v5 }
 0xaaf   :  { %v1263_v1 = vsub.f32 1.0, %v1262_v14 }
 0xab1   :  { %v1264_v9 = vmul.f32 %v2118_v57, %v1263_v1 }
 0xab3   :  { %v1265_v4 = vadd.f32 %v2118_v57, %v1264_v9 }
 0xae8   :  { %v1935_v51 = vpop.permute.xlu0 %1934 }
 0xae9   :  { %v1937_v55 = vunpack.i.h.bf16 %v1935_v51  ;;  %v1936_v56 = vunpack.i.l.bf16 %v1935_v51 }
 0xaeb   :  { %v1450_v45 = vsel %vm129_vm3, %v1936_v56, %v1941_v58  ;;  %v1451_v59 = vsel %vm129_vm3, %v1937_v55, %v1942_v53  ;;  %v1283_v13 = vpop.permute.xlu2 %1282 }
 0xaec   :  { %v1452_v62 = vpack.c.bf16 %v1451_v59, %v1450_v45  ;;  %v1288_v63 = vmul.f32 %v1283_v13, %v2756_v60 }
 0xaee   :  { %1292 = vrot.lane.b32.xlu0 %v1288_v63, %s2258_s21  ;;  %1862 = vmatmul.msk.bf16.vlgmr.msra.gmra.mxu2 %vm390_vm7, %v1452_v62  ;;  %vm1268_vm7 = vmor %vm1266_vm13, %vm1267_vm14 }
 0xaef   :  { %v1269_v25 = vsel %vm1268_vm7, %v2118_v57, %v1265_v4  ;;  %v1891_v57 = vld [vmem:[%s2866_s9] sm:$0xff] }
 0xaf0   :  { %v2767_v42 = vsel %vm1271_vm15, %v1273_v41, %v1269_v25  ;;  %1603 = vmatpush.bf16.msrb.mxu3 %v1891_v57 }
 0xaf1   :  { %v1279_v62 = vmul.f32 %v2767_v42, %v2677_v24 }
 0xb0b   :  { %v1285_v16 = vpop.permute.xlu0 %1284 }
 0xb0c   :  { %v1289_v10 = vmul.f32 %v1285_v16, %v2767_v42 }
 0xb60   :  { %v1293_v61 = vpop.permute.xlu0 %1292 }
 0xb61   :  { %v2769_v15 = vadd.f32 %v1293_v61, %v1278_v26  ;;  %v1893_v26 = vld [vmem:[%s2867_s10] sm:$0xff] }
 0xb71   :  { %v1465_v31 = vpop.f32.mrf.mxu2 }
 0xb72   :  { %v1466_v38 = vadd.f32 %v2153_v37, %v1465_v31 }
 0xb74   :  { %2119 = vtanh.f32 %v1466_v38  ;;  %v1863_v11 = vmul.f32 -1.442695, %v1466_v38 }
 0xb79   :  { %v1467_v7 = vpop.f32.mrf.mxu2 }
 0xb7a   :  { %v2120_v22 = vpop.eup %2119  ;;  %v1468_v23 = vadd.f32 %v2153_v37, %v1467_v7 }
 0xb7b   :  { %1514 = vrot.lane.b32.xlu1 %v2120_v22, %s2257_s2 }
 0xb7c   :  { %2121 = vtanh.f32 %v1468_v23  ;;  %v1864_v33 = vmul.f32 -1.442695, %v1468_v23 }
 0xb7d   :  { %2123 = vtanh.f32 %v2769_v15 }
 0xb7e   :  { %2125 = vpow2.f32 %v1864_v33 }
 0xb82   :  { %v2122_v30 = vpop.eup %2121 }
 0xb83   :  { %1516 = vrot.lane.b32.xlu2 %v2122_v30, %s2257_s2  ;;  %1294 = vrot.lane.b32.xlu1 %v1289_v10, %s2258_s21  ;;  %v2124_v32 = vpop.eup %2123 }
 0xb84   :  { %v2126_v0 = vpop.eup %2125 }
 0xb85   :  { %v1477_v28 = vadd.f32 1.0, %v2126_v0 }
 0xb87   :  { %2127 = vrcp.f32 %v1477_v28  ;;  %v1504_v43 = vand.u32 2147483648, %v1477_v28  ;;  %vm1498_vm4 = vweird.f32 %v1477_v28  ;;  %v1502_v44 = vand.u32 2147483647, %v1477_v28 }
 0xb88   :  { %2129 = vpow2.f32 %v1863_v11 }
 0xb89   :  { %v1505_v46 = vor.u32 1.1754944e-38, %v1504_v43  ;;  %vm1503_vm6 = vcmp.eq.f32.partialorder %v1502_v44, 8.507059e+37 }
 0xb8b   :  { %1304 = vrot.lane.b32.xlu1 %v2124_v32, %s2257_s2  ;;  %v1946_v32 = vld [vmem:[%s2868_s11] ss:$0 sm:$0xff]  ;;  %s2260_s11 = smov [#allocation4]  }
 0xb8c   :  { %s1690_s0 = sshll.u32 %s2260_s11, 4  ;;  %s1691_s0 = int_to_ptr.vmem [resolvable:$true] %s1690_s0 }
 0xb8d   :  { %v2128_v29 = vpop.eup %2127 }
 0xb8e   :  { %v2130_v27 = vpop.eup %2129  ;;  %v1494_v3 = vmul.f32 %v2128_v29, %v1477_v28  ;;  %vm1499_vm0 = vweird.f32 %v2128_v29 }
 0xb8f   :  { %v1476_v34 = vadd.f32 1.0, %v2130_v27  ;;  %vm1500_vm5 = vmor %vm1498_vm4, %vm1499_vm0 }
 0xb90   :  { %v1495_v36 = vsub.f32 1.0, %v1494_v3 }
 0xb91   :  { %2131 = vrcp.f32 %v1476_v34  ;;  %v1489_v53 = vand.u32 2147483648, %v1476_v34  ;;  %vm1483_vm8 = vweird.f32 %v1476_v34  ;;  %v1487_v58 = vand.u32 2147483647, %v1476_v34 }
 0xb92   :  { %v1496_v40 = vmul.f32 %v2128_v29, %v1495_v36 }
 0xb93   :  { %v1490_v56 = vor.u32 1.1754944e-38, %v1489_v53  ;;  %vm1488_vm1 = vcmp.eq.f32.partialorder %v1487_v58, 8.507059e+37 }
 0xb94   :  { %v1497_v39 = vadd.f32 %v2128_v29, %v1496_v40 }
 0xb96   :  { %v1501_v8 = vsel %vm1500_vm5, %v2128_v29, %v1497_v39 }
 0xb97   :  { %v2132_v21 = vpop.eup %2131  ;;  %v1506_v12 = vsel %vm1503_vm6, %v1505_v46, %v1501_v8 }
 0xb98   :  { %v1479_v18 = vmul.f32 %v2132_v21, %v1476_v34  ;;  %vm1484_vm2 = vweird.f32 %v2132_v21  ;;  %v1511_v31 = vmul.f32 %v1506_v12, %v2729_v6  ;;  %v1894_v6 = vld [vmem:[%s2867_s10 + $0x8] sm:$0xff]  ;;  %s2259_s10 = smov 96  }
 0xb99   :  { %vm1485_vm9 = vmor %vm1483_vm8, %vm1484_vm2  ;;  %1570 = vmatpush.bf16.msrb.mxu0 %v1894_v6 }
 0xb9a   :  { %v1480_v50 = vsub.f32 1.0, %v1479_v18 }
 0xb9c   :  { %v1481_v51 = vmul.f32 %v2132_v21, %v1480_v50 }
 0xb9d   :  { %1571 = vmatpush.bf16.msrb.mxu0 %v1893_v26 }
 0xb9e   :  { %v1482_v52 = vadd.f32 %v2132_v21, %v1481_v51 }
 0xba0   :  { %v1486_v55 = vsel %vm1485_vm9, %v2132_v21, %v1482_v52 }
 0xba1   :  { %v1491_v59 = vsel %vm1488_vm1, %v1490_v56, %v1486_v55 }
 0xba2   :  { %v1510_v14 = vmul.f32 %v1491_v59, %v2735_v20 }
 0xbdd   :  { %v1517_v47 = vpop.permute.xlu2 %1516 }
 0xbde   :  { %v1521_v49 = vmul.f32 %v1517_v47, %v1506_v12 }
 0xbe0   :  { %1526 = vrot.lane.b32.xlu0 %v1521_v49, %s2258_s21 }
 0xbed   :  { %v1515_v45 = vpop.permute.xlu1 %1514 }
 0xbee   :  { %v1520_v13 = vmul.f32 %v1515_v45, %v1491_v59 }
 0xbf0   :  { %1524 = vrot.lane.b32.xlu2 %v1520_v13, %s2258_s21 }
 0xbf5   :  { %v1295_v63 = vpop.permute.xlu1 %1294 }
 0xbf6   :  { %v1299_v2 = vadd.f32 %v1295_v63, %v1279_v62 }
 0xbf8   :  { %2133 = vtanh.f32 %v1299_v2 }
 0xbfd   :  { %v1305_v9 = vpop.permute.xlu1 %1304 }
 0xbfe   :  { %v2134_v35 = vpop.eup %2133  ;;  %v1310_v4 = vmul.f32 %v1305_v9, %v2756_v60 }
 0xbff   :  { %1306 = vrot.lane.b32.xlu2 %v2134_v35, %s2257_s2 }
 0xc4a   :  { %v1525_v1 = vpop.permute.xlu2 %1524 }
 0xc4b   :  { %v1530_v24 = vadd.f32 %v1525_v1, %v1510_v14 }
 0xc4d   :  { %2135 = vtanh.f32 %v1530_v24 }
 0xc52   :  { %v1527_v37 = vpop.permute.xlu0 %1526 }
 0xc53   :  { %v2136_v38 = vpop.eup %2135  ;;  %v1531_v16 = vadd.f32 %v1527_v37, %v1511_v31 }
 0xc54   :  { %1536 = vrot.lane.b32.xlu0 %v2136_v38, %s2257_s2 }
 0xc55   :  { %2137 = vtanh.f32 %v1531_v16 }
 0xc59   :  { %v1307_v17 = vpop.permute.xlu2 %1306 }
 0xc5a   :  { %v1311_v19 = vmul.f32 %v1307_v17, %v2767_v42 }
 0xc5b   :  { %v2138_v7 = vpop.eup %2137 }
 0xc5c   :  { %v1544_v22 = vpack.c.bf16 %v1311_v19, %v1310_v4  ;;  %1538 = vrot.lane.b32.xlu1 %v2138_v7, %s2257_s2 }
 0xc5e   :  { %1579 = vrot.lane.b32.xlu2 %v1544_v22, %s2258_s21 }
 0xcb8   :  { %v1580_v20 = vpop.permute.xlu2 %1579 }
 0xcb9   :  { %1882 = vmatmul.msk.bf16.vlgmr.msrb.gmra.mxu3 %vm129_vm3, %v1580_v20 }
 0xcc6   :  { %v1537_v23 = vpop.permute.xlu0 %1536 }
 0xcc7   :  { %v1542_v25 = vmul.f32 %v1537_v23, %v1491_v59 }
 0xcce   :  { %v1539_v41 = vpop.permute.xlu1 %1538 }
 0xccf   :  { %v1543_v60 = vmul.f32 %v1539_v41, %v1506_v12 }
 0xcd1   :  { %v1545_v61 = vpack.c.bf16 %v1543_v60, %v1542_v25 }
 0xcd3   :  { %1547 = vrot.lane.b32.xlu0 %v1545_v61, %s2258_s21 }
 0xcdb   :  { %1641 = vrot.lane.b32.xlu0 %v1310_v4, %s2258_s21 }
 0xd3c   :  { %v1605_v30 = vpop.f32.mrf.mxu3 }
 0xd44   :  { %v1607_v29 = vpop.f32.mrf.mxu3 }
 0xd45   :  { %v1548_v42 = vpop.permute.xlu0 %1547 }
 0xd46   :  { %1873 = vmatmul.msk.bf16.vlgmr.msrb.gmra.mxu0 %vm129_vm3, %v1548_v42 }
 0xd4d   :  { %v1642_v10 = vpop.permute.xlu0 %1641 }
 0xd4e   :  { %1647 = vst.msk [vmem:[#allocation2] sm:$0xff] %vm129_vm3, %v1642_v10 }
 0xdc3   :  { %v1573_v33 = vpop.f32.mrf.mxu0 }
 0xdc4   :  { %v1606_v0 = vadd.f32 %v1605_v30, %v1573_v33 }
 0xdc6   :  { %v1610_v28 = vadd.f32 %v1946_v32, %v1606_v0 }
 0xdc8   :  { %v1613_v11 = vsel %vm1612_vm10, %v1610_v28, -inf }
 0xdc9   :  { %1614 = vmax.xlane.f32.xlu1 %v1613_v11 }
 0xdcb   :  { %v1575_v27 = vpop.f32.mrf.mxu0 }
 0xdcc   :  { %v1608_v3 = vadd.f32 %v1607_v29, %v1575_v27 }
 0xdce   :  { %v1611_v34 = vadd.f32 %v1946_v32, %v1608_v3 }
 0xdd0   :  { %v1616_v36 = vsel %vm1612_vm10, %v1611_v34, -inf }
 0xdd1   :  { %1617 = vmax.xlane.f32.xlu2 %v1616_v36 }
 0xde2   :  { %1651 = vrot.lane.b32.xlu1 %v2769_v15, %s2259_s10 }
 0xde9   :  { %1653 = vrot.lane.b32.xlu2 %v1299_v2, %s2259_s10 }
 0xdea   :  { %1643 = vrot.lane.b32.xlu1 %v1311_v19, %s2258_s21 }
 0xe3c   :  { %v1615_v40 = vpop.xlane.xlu1 %1614 }
 0xe3d   :  { %v1619_v39 = vsub.f32 %v1610_v28, %v1615_v40 }
 0xe3f   :  { %v1621_v21 = vmul.f32 1.442695, %v1619_v39 }
 0xe41   :  { %2139 = vpow2.f32 %v1621_v21 }
 0xe44   :  { %v1618_v43 = vpop.xlane.xlu2 %1617 }
 0xe45   :  { %v1620_v44 = vsub.f32 %v1611_v34, %v1618_v43 }
 0xe47   :  { %v2140_v8 = vpop.eup %2139  ;;  %v1623_v18 = vmul.f32 1.442695, %v1620_v44 }
 0xe48   :  { %v1625_v46 = vsel %vm1612_vm10, %v2140_v8, 0.0 }
 0xe49   :  { %2141 = vpow2.f32 %v1623_v18  ;;  %1626 = vadd.xlane.f32.xlu0 %v1625_v46 }
 0xe4c   :  { %v1654_v47 = vpop.permute.xlu2 %1653 }
 0xe4d   :  { %1658 = vst.msk [vmem:[#allocation4 + $0x8] sm:$0xff] %vm129_vm3, %v1654_v47 }
 0xe4f   :  { %v2142_v15 = vpop.eup %2141 }
 0xe50   :  { %v1628_v12 = vsel %vm1612_vm10, %v2142_v15, 0.0 }
 0xe51   :  { %1629 = vadd.xlane.f32.xlu2 %v1628_v12 }
 0xe54   :  { %v1652_v49 = vpop.permute.xlu1 %1651 }
 0xe55   :  { %1657 = vst.msk [vmem:[#allocation4] sm:$0xff] %vm129_vm3, %v1652_v49 }
 0xe56   :  { %1698 = dma.vmem_to_hbm [thread:$0]  %s1691_s0, 256, %s1693_s4, [#allocation5], %s2263_s8, %s2263_s8, %s2264_s14  }
 0xe57   :  { %1711 = dma.vmem_to_hbm [thread:$0]  %s1704_s22, 256, %s1706_s24, [#allocation5], %s2263_s8, %s2263_s8, %s2264_s14  }
 0xe5c   :  { %v1644_v50 = vpop.permute.xlu1 %1643 }
 0xe5d   :  { %1648 = vst.msk [vmem:[#allocation2 + $0x8] sm:$0xff] %vm129_vm3, %v1644_v50  ;;  %1663 = vrot.lane.b32.xlu0 %v2424_v48, %s2259_s10 }
 0xe5e   :  { %1685 = dma.vmem_to_hbm [thread:$0]  %s1678_s25, 256, %s1680_s18, [#allocation3], %s2263_s8, %s2263_s8, %s2264_s14  }
 0xe69   :  { %1665 = vrot.lane.b32.xlu2 %v2441_v54, %s2259_s10 }
 0xebc   :  { %v1627_v51 = vpop.xlane.xlu0 %1626 }
 0xebd   :  { %2143 = vlog2.f32 %v1627_v51 }
 0xec3   :  { %v2144_v52 = vpop.eup %2143 }
 0xec4   :  { %v1632_v53 = vmul.f32 0.6931472, %v2144_v52  ;;  %v1630_v58 = vpop.xlane.xlu2 %1629 }
 0xec5   :  { %2145 = vlog2.f32 %v1630_v58 }
 0xec6   :  { %v1635_v55 = vsub.f32 %v1619_v39, %v1632_v53 }
 0xec8   :  { %1637 = vst.msk [vmem:[%s2869_s12] sm:$0xff] %vm1612_vm10, %v1635_v55 }
 0xecb   :  { %v2146_v48 = vpop.eup %2145 }
 0xecc   :  { %v1634_v56 = vmul.f32 0.6931472, %v2146_v48  ;;  %v1666_v45 = vpop.permute.xlu2 %1665 }
 0xecd   :  { %1670 = vst.msk [vmem:[#allocation7 + $0x8] sm:$0xff] %vm129_vm3, %v1666_v45 }
 0xece   :  { %v1636_v54 = vsub.f32 %v1620_v44, %v1634_v56 }
 0xecf   :  { %v1664_v59 = vpop.permute.xlu0 %1663 }
 0xed0   :  { %1638 = vst.msk [vmem:[%s2869_s12 + $0x8] sm:$0xff] %vm1612_vm10, %v1636_v54 }
 0xed1   :  { %1669 = vst.msk [vmem:[#allocation7] sm:$0xff] %vm129_vm3, %v1664_v59 }
 0xed2   :  { %1724 = dma.vmem_to_hbm [thread:$0]  %s1717_s27, 256, %s1719_s29, [#allocation8], %s2263_s8, %s2263_s8, %s2264_s14  }
 0xed3   :  { %2250 = dma.done.wait [#allocation3], 256  }
 0xed4   :  { %2251 = vsyncadd [#allocation3], 4294967040 }
 0xed5   :  { %2252 = dma.done.wait [#allocation5], 512  }
 0xed6   :  { %2253 = vsyncadd [#allocation5], 4294966784 }
 0xed7   :  { %2254 = dma.done.wait [#allocation8], 256  }
 0xed8   :  { %2255 = vsyncadd [#allocation8], 4294967040 }
 0xed9   :  { %1743 = vsyncpa [#allocation3], 1 }
 0xeda   :  { %1744 = vsyncpa [#allocation5], 1 }
 0xedb   :  { %1745 = vsyncpa [#allocation8], 1 }

</bundles_post_ra>
